<compile_context>
chip_gen: v5e
topology: v5e:2x2
jax: 0.10.0
libtpu: 0.0.40
codegen_flags: <defaults>
</compile_context>

<pallas_src>
import functools
import math

import jax
import jax.numpy as jnp
from jax.experimental import pallas as pl
from jax.experimental.pallas import tpu as pltpu

EPS = 1e-5


# ----------------------------------------------------------------------------
# Fused kernel: embedding + all encoder layers, one batch block per grid step
# ----------------------------------------------------------------------------
def _fused_encoder_kernel(feat_ref, wemb_ref, wqkv_ref, wc_ref, w1_ref, w2_ref,
                          b1_ref, vece_ref, out_ref, *, head_num, qkv_dim,
                          n_layers, bb, seq_len):
    E = wemb_ref.shape[1]
    HD = head_num * qkv_dim
    N = seq_len
    M = bb * N
    bf16 = jnp.bfloat16

    # ---- initial depot / node embedding: ONE matmul, biases folded into W ---
    feats = feat_ref[...].reshape(M, feat_ref.shape[-1])            # (M, 8) f32
    x = jnp.dot(feats, wemb_ref[...],
                preferred_element_type=jnp.float32)                 # (M, E)

    # ---- encoder layers: statically unrolled, weights resident in VMEM -----
    for li in range(n_layers):
        vec = vece_ref[li]                                          # (6, E) f32
        bc, g1, be1 = vec[0:1], vec[1:2], vec[2:3]
        b2, g2, be2 = vec[3:4], vec[4:5], vec[5:6]

        xf = x                                                      # (M, E) f32
        # Fused Q/K/V projection, bf16 MXU operands, f32 accumulation.
        # The 1/sqrt(qkv_dim) scale is pre-folded into the Wq block.
        qkv = jnp.dot(xf.astype(bf16), wqkv_ref[li],
                      preferred_element_type=jnp.float32)           # (M, 3*HD)

        # Heads: static unroll; each head's output is combined with its slice
        # of Wc and accumulated -> no H-way lane concatenate.
        mh = jnp.zeros((M, E), jnp.float32)
        for h in range(head_num):
            lo = h * qkv_dim
            q = qkv[:, lo:lo + qkv_dim].reshape(bb, N, qkv_dim)
            k = qkv[:, HD + lo:HD + lo + qkv_dim].reshape(bb, N, qkv_dim)
            v = qkv[:, 2 * HD + lo:2 * HD + lo + qkv_dim].reshape(bb, N, qkv_dim)
            s = jnp.einsum("bnd,bmd->bnm", q.astype(bf16), k.astype(bf16),
                           preferred_element_type=jnp.float32)      # (bb, N, N)
            s = s - jnp.max(s, axis=-1, keepdims=True)
            p = jnp.exp(s)
            p = p * pl.reciprocal(jnp.sum(p, axis=-1, keepdims=True), approx=True)
            o_h = jnp.einsum("bnm,bmd->bnd", p.astype(bf16), v.astype(bf16),
                             preferred_element_type=jnp.float32)    # (bb, N, d)
            mh = mh + jnp.dot(o_h.reshape(M, qkv_dim).astype(bf16),
                              wc_ref[li * head_num + h],
                              preferred_element_type=jnp.float32)   # (M, E)
        mh = mh + bc

        # Add & InstanceNorm 1 (per batch element, per channel, over sequence)
        a1 = (xf + mh).reshape(bb, N, E)
        c1 = a1 - jnp.mean(a1, axis=1, keepdims=True)
        v1 = jnp.mean(c1 * c1, axis=1, keepdims=True)
        o1 = c1 * jax.lax.rsqrt(v1 + EPS) * g1 + be1

        # FeedForward
        o1f = o1.reshape(M, E)
        h1 = jnp.maximum(
            jnp.dot(o1f.astype(bf16), w1_ref[li],
                    preferred_element_type=jnp.float32) + b1_ref[li], 0.0)
        ff = jnp.dot(h1.astype(bf16), w2_ref[li],
                     preferred_element_type=jnp.float32) + b2

        # Add & InstanceNorm 2
        a2 = (o1f + ff).reshape(bb, N, E)
        c2 = a2 - jnp.mean(a2, axis=1, keepdims=True)
        v2 = jnp.mean(c2 * c2, axis=1, keepdims=True)
        x = (c2 * jax.lax.rsqrt(v2 + EPS) * g2 + be2).reshape(M, E)

    out_ref[...] = x.reshape(bb, N, E)


# ----------------------------------------------------------------------------
# Host-side packing: fold biases / scale, stack per-layer weights, cast to bf16
# ----------------------------------------------------------------------------
def pack_params(params, head_num, qkv_dim):
    E = params["Wd"].shape[1]
    layers = params["layers"]
    scale = 1.0 / math.sqrt(qkv_dim)
    # Combined embedding weight for 8-wide features
    # [depot_x, depot_y, node_x, node_y, demand, is_depot, is_node, 0]
    w_emb = jnp.concatenate(
        [params["Wd"], params["Wn"], params["bd"], params["bn"],
         jnp.zeros((1, E), jnp.float32)], axis=0)                    # (8, E)
    return {
        "W_emb": w_emb,
        # Fused, pre-scaled Q/K/V projection per layer: (L, E, 3*H*D) bf16
        "Wqkv": jnp.stack([
            jnp.concatenate([p["Wq"] * scale, p["Wk"], p["Wv"]], axis=1)
            for p in layers]).astype(jnp.bfloat16),
        # Per-head combine weights: (L*H, D, E) bf16
        "Wc": jnp.concatenate(
            [p["Wc"].reshape(head_num, qkv_dim, E) for p in layers],
            axis=0).astype(jnp.bfloat16),
        "W1": jnp.stack([p["W1"] for p in layers]).astype(jnp.bfloat16),  # (L,E,FF)
        "W2": jnp.stack([p["W2"] for p in layers]).astype(jnp.bfloat16),  # (L,FF,E)
        "b1": jnp.stack([p["b1"] for p in layers]),                       # (L,1,FF)
        # Packed small f32 vectors: rows = [bc, g1, be1, b2, g2, be2] -> (L,6,E)
        "vecE": jnp.stack([jnp.concatenate(
            [p["bc"], p["g1"], p["be1"], p["b2"], p["g2"], p["be2"]], axis=0)
            for p in layers]),
    }


def _build_features(depot_xy, node_xy_demand):
    """(B, N, 8) combined feature tensor: no sequence concat inside the kernel."""
    B, Nd, _ = depot_xy.shape
    _, Nn, _ = node_xy_demand.shape
    z = lambda n, w: jnp.zeros((B, n, w), jnp.float32)
    o = lambda n: jnp.ones((B, n, 1), jnp.float32)
    fd = jnp.concatenate([depot_xy, z(Nd, 3), o(Nd), z(Nd, 2)], axis=-1)
    fn = jnp.concatenate([z(Nn, 2), node_xy_demand, z(Nn, 1), o(Nn), z(Nn, 1)],
                         axis=-1)
    return jnp.concatenate([fd, fn], axis=1)                         # (B, N, 8)


# ----------------------------------------------------------------------------
# Wrapper: ONE pallas_call; grid depends on chip generation & VMEM budget
# ----------------------------------------------------------------------------
def _tpu_kind():
    try:
        return jax.devices()[0].device_kind.lower()
    except Exception:
        return ""


def _choose_grid(B, N, E, HD, FF, cores):
    # Per-step f32 activation working set (x, residuals, qkv, scores, h1)
    def step_bytes(bb):
        m = bb * N
        return 4 * (3 * m * E + 3 * m * HD + bb * N * N + m * FF)
    G = cores if (cores > 1 and B % cores == 0) else 1
    budget = 16 * 1024 * 1024
    while step_bytes(B // G) > budget and B % (G * 2) == 0:
        G *= 2
    return G


def cvrp_encoder_forward(depot_xy, node_xy_demand, packed, head_num, qkv_dim,
                         n_layers):
    B, Nd, _ = depot_xy.shape
    _, Nn, _ = node_xy_demand.shape
    E = packed["W_emb"].shape[1]
    HD = head_num * qkv_dim
    FF = packed["W1"].shape[2]
    N = Nd + Nn

    feats = _build_features(depot_xy, node_xy_demand)                # (B, N, 8)

    kind = _tpu_kind()
    # Single-TC chips (v5e/v6e): never split the batch "for parallelism".
    cores = 2 if any(t in kind for t in ("v7", "v5p", "v4")) else 1
    G = _choose_grid(B, N, E, HD, FF, cores)
    bb = B // G
    vmem_limit = (48 << 20) if "v7" in kind else (96 << 20)

    kern = functools.partial(_fused_encoder_kernel, head_num=head_num,
                             qkv_dim=qkv_dim, n_layers=n_layers, bb=bb,
                             seq_len=N)

    def wspec(shape):
        nd = len(shape)
        return pl.BlockSpec(shape, lambda g, _nd=nd: (0,) * _nd)

    return pl.pallas_call(
        kern,
        out_shape=jax.ShapeDtypeStruct((B, N, E), jnp.float32),
        grid=(G,),
        in_specs=[
            pl.BlockSpec((bb, N, feats.shape[-1]), lambda g: (g, 0, 0)),
            wspec(packed["W_emb"].shape),
            wspec(packed["Wqkv"].shape),
            wspec(packed["Wc"].shape),
            wspec(packed["W1"].shape),
            wspec(packed["W2"].shape),
            wspec(packed["b1"].shape),
            wspec(packed["vecE"].shape),
        ],
        out_specs=pl.BlockSpec((bb, N, E), lambda g: (g, 0, 0)),
        compiler_params=pltpu.CompilerParams(
            dimension_semantics=("parallel",),
            vmem_limit_bytes=vmem_limit),
    )(feats, packed["W_emb"], packed["Wqkv"], packed["Wc"], packed["W1"],
      packed["W2"], packed["b1"], packed["vecE"])


# ----------------------------------------------------------------------------
# Parameter init (deterministic, synthetic)
# ----------------------------------------------------------------------------
def init_params(key, embedding_dim, head_num, qkv_dim, ff_hidden_dim, n_layers):
    E, HD, FF = embedding_dim, head_num * qkv_dim, ff_hidden_dim

    def nrm(k, shape, scl=0.1):
        return scl * jax.random.normal(k, shape, dtype=jnp.float32)

    keys = jax.random.split(key, 4 + n_layers)
    params = {
        "Wd": nrm(keys[0], (2, E)), "bd": nrm(keys[1], (1, E)),
        "Wn": nrm(keys[2], (3, E)), "bn": nrm(keys[3], (1, E)),
        "layers": [],
    }
    for li in range(n_layers):
        lk = jax.random.split(keys[4 + li], 12)
        params["layers"].append({
            "Wq": nrm(lk[0], (E, HD)), "Wk": nrm(lk[1], (E, HD)), "Wv": nrm(lk[2], (E, HD)),
            "Wc": nrm(lk[3], (HD, E)), "bc": nrm(lk[4], (1, E)),
            "g1": 1.0 + nrm(lk[5], (1, E)), "be1": nrm(lk[6], (1, E)),
            "W1": nrm(lk[7], (E, FF)), "b1": nrm(lk[8], (1, FF)),
            "W2": nrm(lk[9], (FF, E)), "b2": nrm(lk[10], (1, E)),
            "g2": 1.0 + nrm(lk[11], (1, E)), "be2": jnp.zeros((1, E), jnp.float32),
        })
    return params


# ----------------------------------------------------------------------------
# Pure-JAX reference (mirrors the PyTorch module, full f32) for the check
# ----------------------------------------------------------------------------
def _ref_forward(depot_xy, node_xy_demand, params, head_num, qkv_dim):
    d = depot_xy @ params["Wd"] + params["bd"]
    n = node_xy_demand @ params["Wn"] + params["bn"]
    x = jnp.concatenate([d, n], axis=1)
    B, N, E = x.shape
    for p in params["layers"]:
        q = (x @ p["Wq"]).reshape(B, N, head_num, qkv_dim).transpose(0, 2, 1, 3)
        k = (x @ p["Wk"]).reshape(B, N, head_num, qkv_dim).transpose(0, 2, 1, 3)
        v = (x @ p["Wv"]).reshape(B, N, head_num, qkv_dim).transpose(0, 2, 1, 3)
        s = jnp.einsum("bhnd,bhmd->bhnm", q, k) / jnp.sqrt(jnp.float32(qkv_dim))
        w = jax.nn.softmax(s, axis=-1)
        o = jnp.einsum("bhnm,bhmd->bhnd", w, v).transpose(0, 2, 1, 3).reshape(B, N, -1)
        mh = o @ p["Wc"] + p["bc"]
        a1 = x + mh
        m1 = a1.mean(axis=1, keepdims=True)
        v1 = ((a1 - m1) ** 2).mean(axis=1, keepdims=True)
        o1 = (a1 - m1) / jnp.sqrt(v1 + EPS) * p["g1"] + p["be1"]
        ff = jnp.maximum(o1 @ p["W1"] + p["b1"], 0.0) @ p["W2"] + p["b2"]
        a2 = o1 + ff
        m2 = a2.mean(axis=1, keepdims=True)
        v2 = ((a2 - m2) ** 2).mean(axis=1, keepdims=True)
        x = (a2 - m2) / jnp.sqrt(v2 + EPS) * p["g2"] + p["be2"]
    return x


if __name__ == "__main__":
    # model hyperparameters (small, consistent with the module)
    embedding_dim = 32
    head_num = 4
    qkv_dim = 8
    ff_hidden_dim = 64
    encoder_layer_num = 2

    batch = 2
    n_depot = 1
    n_nodes = 7   # total sequence length N = 8

    key = jax.random.PRNGKey(0)
    k_par, k_d, k_n = jax.random.split(key, 3)
    params = init_params(k_par, embedding_dim, head_num, qkv_dim,
                         ff_hidden_dim, encoder_layer_num)
    packed = pack_params(params, head_num, qkv_dim)

    depot_xy = jax.random.uniform(k_d, (batch, n_depot, 2), dtype=jnp.float32)
    node_xy_demand = jax.random.uniform(k_n, (batch, n_nodes, 3), dtype=jnp.float32)

    out = cvrp_encoder_forward(depot_xy, node_xy_demand, packed,
                               head_num, qkv_dim, encoder_layer_num)
    out = jax.block_until_ready(out)

    ref = _ref_forward(depot_xy, node_xy_demand, params, head_num, qkv_dim)
    assert out.shape == (batch, n_depot + n_nodes, embedding_dim)
    err = float(jnp.max(jnp.abs(out - ref)))
    # bf16 MXU operands + approx softmax reciprocal -> relaxed tolerance
    assert err < 3e-2, f"Pallas output mismatch vs JAX reference (max abs err {err})"

    print("KERNEL_OK")
</pallas_src>

<mosaic_0001>
module attributes {stable_mosaic.version = 11 : i64} {
  func.func @_fused_encoder_kernel(%arg0: i32, %arg1: memref<2x8x8xf32, #tpu.memory_space<vmem>>, %arg2: memref<8x32xf32, #tpu.memory_space<vmem>>, %arg3: memref<2x32x96xbf16, #tpu.memory_space<vmem>>, %arg4: memref<8x8x32xbf16, #tpu.memory_space<vmem>>, %arg5: memref<2x32x64xbf16, #tpu.memory_space<vmem>>, %arg6: memref<2x64x32xbf16, #tpu.memory_space<vmem>>, %arg7: memref<2x1x64xf32, #tpu.memory_space<vmem>>, %arg8: memref<2x6x32xf32, #tpu.memory_space<vmem>>, %arg9: memref<2x8x32xf32, #tpu.memory_space<vmem>>) attributes {dimension_semantics = [#tpu.dimension_semantics<parallel>], iteration_bounds = array<i64: 1>, scalar_prefetch = 0 : i64, scratch_operands = 0 : i64, tpu.core_type = #tpu.core_type<tc>, window_params = [{transform_indices = @transform_0, window_bounds = array<i64: 2, 8, 8>}, {pipeline_mode = #tpu.pipeline_mode<synchronous>, transform_indices = @transform_1, window_bounds = array<i64: 8, 32>}, {pipeline_mode = #tpu.pipeline_mode<synchronous>, transform_indices = @transform_2, window_bounds = array<i64: 2, 32, 96>}, {pipeline_mode = #tpu.pipeline_mode<synchronous>, transform_indices = @transform_3, window_bounds = array<i64: 8, 8, 32>}, {pipeline_mode = #tpu.pipeline_mode<synchronous>, transform_indices = @transform_4, window_bounds = array<i64: 2, 32, 64>}, {pipeline_mode = #tpu.pipeline_mode<synchronous>, transform_indices = @transform_5, window_bounds = array<i64: 2, 64, 32>}, {pipeline_mode = #tpu.pipeline_mode<synchronous>, transform_indices = @transform_6, window_bounds = array<i64: 2, 1, 64>}, {pipeline_mode = #tpu.pipeline_mode<synchronous>, transform_indices = @transform_7, window_bounds = array<i64: 2, 6, 32>}, {transform_indices = @transform_8, window_bounds = array<i64: 2, 8, 32>}]} {
    %c0 = arith.constant 0 : index
    %c0_0 = arith.constant 0 : index
    %c0_1 = arith.constant 0 : index
    %0 = vector.load %arg1[%c0, %c0_0, %c0_1] : memref<2x8x8xf32, #tpu.memory_space<vmem>>, vector<2x8x8xf32>
    %1 = vector.shape_cast %0 : vector<2x8x8xf32> to vector<16x8xf32>
    %c0_2 = arith.constant 0 : index
    %c0_3 = arith.constant 0 : index
    %2 = vector.load %arg2[%c0_2, %c0_3] : memref<8x32xf32, #tpu.memory_space<vmem>>, vector<8x32xf32>
    %cst = arith.constant dense<0.000000e+00> : vector<16x32xf32>
    %3 = tpu.matmul %1, %2, %cst {dimension_numbers = #tpu.dot_dimension_numbers<[1], [0], [0], [1], [0, 0, 1, 1], [], []>} : vector<16x8xf32>, vector<8x32xf32>, vector<16x32xf32> -> vector<16x32xf32>
    %c0_4 = arith.constant 0 : index
    %c0_5 = arith.constant 0 : index
    %c0_6 = arith.constant 0 : index
    %4 = vector.load %arg8[%c0_4, %c0_5, %c0_6] : memref<2x6x32xf32, #tpu.memory_space<vmem>>, vector<1x6x32xf32>
    %5 = vector.shape_cast %4 : vector<1x6x32xf32> to vector<6x32xf32>
    %6 = vector.extract_strided_slice %5 {offsets = [0, 0], sizes = [1, 32], strides = [1, 1]} : vector<6x32xf32> to vector<1x32xf32>
    %7 = vector.extract_strided_slice %5 {offsets = [1, 0], sizes = [1, 32], strides = [1, 1]} : vector<6x32xf32> to vector<1x32xf32>
    %8 = vector.extract_strided_slice %5 {offsets = [2, 0], sizes = [1, 32], strides = [1, 1]} : vector<6x32xf32> to vector<1x32xf32>
    %9 = vector.extract_strided_slice %5 {offsets = [3, 0], sizes = [1, 32], strides = [1, 1]} : vector<6x32xf32> to vector<1x32xf32>
    %10 = vector.extract_strided_slice %5 {offsets = [4, 0], sizes = [1, 32], strides = [1, 1]} : vector<6x32xf32> to vector<1x32xf32>
    %11 = vector.extract_strided_slice %5 {offsets = [5, 0], sizes = [1, 32], strides = [1, 1]} : vector<6x32xf32> to vector<1x32xf32>
    %12 = arith.truncf %3 : vector<16x32xf32> to vector<16x32xbf16>
    %c0_7 = arith.constant 0 : index
    %c0_8 = arith.constant 0 : index
    %c0_9 = arith.constant 0 : index
    %13 = vector.load %arg3[%c0_7, %c0_8, %c0_9] : memref<2x32x96xbf16, #tpu.memory_space<vmem>>, vector<1x32x96xbf16>
    %14 = vector.shape_cast %13 : vector<1x32x96xbf16> to vector<32x96xbf16>
    %cst_10 = arith.constant dense<0.000000e+00> : vector<16x96xf32>
    %15 = tpu.matmul %12, %14, %cst_10 {dimension_numbers = #tpu.dot_dimension_numbers<[1], [0], [0], [1], [0, 0, 1, 1], [], []>} : vector<16x32xbf16>, vector<32x96xbf16>, vector<16x96xf32> -> vector<16x96xf32>
    %cst_11 = arith.constant 0.000000e+00 : f32
    %16 = vector.broadcast %cst_11 : f32 to vector<16x32xf32>
    %17 = vector.extract_strided_slice %15 {offsets = [0, 0], sizes = [16, 8], strides = [1, 1]} : vector<16x96xf32> to vector<16x8xf32>
    %18 = vector.shape_cast %17 : vector<16x8xf32> to vector<2x8x8xf32>
    %19 = vector.extract_strided_slice %15 {offsets = [0, 32], sizes = [16, 8], strides = [1, 1]} : vector<16x96xf32> to vector<16x8xf32>
    %20 = vector.shape_cast %19 : vector<16x8xf32> to vector<2x8x8xf32>
    %21 = vector.extract_strided_slice %15 {offsets = [0, 64], sizes = [16, 8], strides = [1, 1]} : vector<16x96xf32> to vector<16x8xf32>
    %22 = vector.shape_cast %21 : vector<16x8xf32> to vector<2x8x8xf32>
    %23 = arith.truncf %18 : vector<2x8x8xf32> to vector<2x8x8xbf16>
    %24 = arith.truncf %20 : vector<2x8x8xf32> to vector<2x8x8xbf16>
    "tpu.trace_start"() <{level = 10 : i32, message = "bnd,bmd->bnm"}> : () -> ()
    %cst_12 = arith.constant dense<0.000000e+00> : vector<2x8x8xf32>
    %25 = tpu.matmul %23, %24, %cst_12 {dimension_numbers = #tpu.dot_dimension_numbers<[2], [2], [1], [1], [0, 0, 0, 1, 1, 1], [0], [0]>} : vector<2x8x8xbf16>, vector<2x8x8xbf16>, vector<2x8x8xf32> -> vector<2x8x8xf32>
    "tpu.trace_stop"() : () -> ()
    %cst_13 = arith.constant dense<0xFF800000> : vector<2x8xf32>
    %26 = vector.multi_reduction <maximumf>, %25, %cst_13 [2] : vector<2x8x8xf32> to vector<2x8xf32>
    %27 = vector.shape_cast %26 : vector<2x8xf32> to vector<2x8x1xf32>
    %28 = vector.broadcast %27 : vector<2x8x1xf32> to vector<2x8x8xf32>
    %29 = arith.subf %25, %28 : vector<2x8x8xf32>
    %30 = math.exp %29 : vector<2x8x8xf32>
    %cst_14 = arith.constant dense<0.000000e+00> : vector<2x8xf32>
    %31 = vector.multi_reduction <add>, %30, %cst_14 [2] : vector<2x8x8xf32> to vector<2x8xf32>
    %32 = vector.shape_cast %31 : vector<2x8xf32> to vector<2x8x1xf32>
    %33 = tpu.reciprocal %32 {approx = true} : vector<2x8x1xf32> -> vector<2x8x1xf32>
    %34 = vector.broadcast %33 : vector<2x8x1xf32> to vector<2x8x8xf32>
    %35 = arith.mulf %30, %34 : vector<2x8x8xf32>
    %36 = arith.truncf %35 : vector<2x8x8xf32> to vector<2x8x8xbf16>
    %37 = arith.truncf %22 : vector<2x8x8xf32> to vector<2x8x8xbf16>
    "tpu.trace_start"() <{level = 10 : i32, message = "bnm,bmd->bnd"}> : () -> ()
    %cst_15 = arith.constant dense<0.000000e+00> : vector<2x8x8xf32>
    %38 = tpu.matmul %36, %37, %cst_15 {dimension_numbers = #tpu.dot_dimension_numbers<[2], [1], [1], [2], [0, 0, 0, 1, 1, 2], [0], [0]>} : vector<2x8x8xbf16>, vector<2x8x8xbf16>, vector<2x8x8xf32> -> vector<2x8x8xf32>
    "tpu.trace_stop"() : () -> ()
    %39 = vector.shape_cast %38 : vector<2x8x8xf32> to vector<16x8xf32>
    %40 = arith.truncf %39 : vector<16x8xf32> to vector<16x8xbf16>
    %c0_16 = arith.constant 0 : index
    %c0_17 = arith.constant 0 : index
    %c0_18 = arith.constant 0 : index
    %41 = vector.load %arg4[%c0_16, %c0_17, %c0_18] : memref<8x8x32xbf16, #tpu.memory_space<vmem>>, vector<1x8x32xbf16>
    %42 = vector.shape_cast %41 : vector<1x8x32xbf16> to vector<8x32xbf16>
    %cst_19 = arith.constant dense<0.000000e+00> : vector<16x32xf32>
    %43 = tpu.matmul %40, %42, %cst_19 {dimension_numbers = #tpu.dot_dimension_numbers<[1], [0], [0], [1], [0, 0, 1, 1], [], []>} : vector<16x8xbf16>, vector<8x32xbf16>, vector<16x32xf32> -> vector<16x32xf32>
    %44 = arith.addf %16, %43 : vector<16x32xf32>
    %45 = vector.extract_strided_slice %15 {offsets = [0, 8], sizes = [16, 8], strides = [1, 1]} : vector<16x96xf32> to vector<16x8xf32>
    %46 = vector.shape_cast %45 : vector<16x8xf32> to vector<2x8x8xf32>
    %47 = vector.extract_strided_slice %15 {offsets = [0, 40], sizes = [16, 8], strides = [1, 1]} : vector<16x96xf32> to vector<16x8xf32>
    %48 = vector.shape_cast %47 : vector<16x8xf32> to vector<2x8x8xf32>
    %49 = vector.extract_strided_slice %15 {offsets = [0, 72], sizes = [16, 8], strides = [1, 1]} : vector<16x96xf32> to vector<16x8xf32>
    %50 = vector.shape_cast %49 : vector<16x8xf32> to vector<2x8x8xf32>
    %51 = arith.truncf %46 : vector<2x8x8xf32> to vector<2x8x8xbf16>
    %52 = arith.truncf %48 : vector<2x8x8xf32> to vector<2x8x8xbf16>
    "tpu.trace_start"() <{level = 10 : i32, message = "bnd,bmd->bnm"}> : () -> ()
    %cst_20 = arith.constant dense<0.000000e+00> : vector<2x8x8xf32>
    %53 = tpu.matmul %51, %52, %cst_20 {dimension_numbers = #tpu.dot_dimension_numbers<[2], [2], [1], [1], [0, 0, 0, 1, 1, 1], [0], [0]>} : vector<2x8x8xbf16>, vector<2x8x8xbf16>, vector<2x8x8xf32> -> vector<2x8x8xf32>
    "tpu.trace_stop"() : () -> ()
    %cst_21 = arith.constant dense<0xFF800000> : vector<2x8xf32>
    %54 = vector.multi_reduction <maximumf>, %53, %cst_21 [2] : vector<2x8x8xf32> to vector<2x8xf32>
    %55 = vector.shape_cast %54 : vector<2x8xf32> to vector<2x8x1xf32>
    %56 = vector.broadcast %55 : vector<2x8x1xf32> to vector<2x8x8xf32>
    %57 = arith.subf %53, %56 : vector<2x8x8xf32>
    %58 = math.exp %57 : vector<2x8x8xf32>
    %cst_22 = arith.constant dense<0.000000e+00> : vector<2x8xf32>
    %59 = vector.multi_reduction <add>, %58, %cst_22 [2] : vector<2x8x8xf32> to vector<2x8xf32>
    %60 = vector.shape_cast %59 : vector<2x8xf32> to vector<2x8x1xf32>
    %61 = tpu.reciprocal %60 {approx = true} : vector<2x8x1xf32> -> vector<2x8x1xf32>
    %62 = vector.broadcast %61 : vector<2x8x1xf32> to vector<2x8x8xf32>
    %63 = arith.mulf %58, %62 : vector<2x8x8xf32>
    %64 = arith.truncf %63 : vector<2x8x8xf32> to vector<2x8x8xbf16>
    %65 = arith.truncf %50 : vector<2x8x8xf32> to vector<2x8x8xbf16>
    "tpu.trace_start"() <{level = 10 : i32, message = "bnm,bmd->bnd"}> : () -> ()
    %cst_23 = arith.constant dense<0.000000e+00> : vector<2x8x8xf32>
    %66 = tpu.matmul %64, %65, %cst_23 {dimension_numbers = #tpu.dot_dimension_numbers<[2], [1], [1], [2], [0, 0, 0, 1, 1, 2], [0], [0]>} : vector<2x8x8xbf16>, vector<2x8x8xbf16>, vector<2x8x8xf32> -> vector<2x8x8xf32>
    "tpu.trace_stop"() : () -> ()
    %67 = vector.shape_cast %66 : vector<2x8x8xf32> to vector<16x8xf32>
    %68 = arith.truncf %67 : vector<16x8xf32> to vector<16x8xbf16>
    %c1 = arith.constant 1 : index
    %c0_24 = arith.constant 0 : index
    %c0_25 = arith.constant 0 : index
    %69 = vector.load %arg4[%c1, %c0_24, %c0_25] : memref<8x8x32xbf16, #tpu.memory_space<vmem>>, vector<1x8x32xbf16>
    %70 = vector.shape_cast %69 : vector<1x8x32xbf16> to vector<8x32xbf16>
    %cst_26 = arith.constant dense<0.000000e+00> : vector<16x32xf32>
    %71 = tpu.matmul %68, %70, %cst_26 {dimension_numbers = #tpu.dot_dimension_numbers<[1], [0], [0], [1], [0, 0, 1, 1], [], []>} : vector<16x8xbf16>, vector<8x32xbf16>, vector<16x32xf32> -> vector<16x32xf32>
    %72 = arith.addf %44, %71 : vector<16x32xf32>
    %73 = vector.extract_strided_slice %15 {offsets = [0, 16], sizes = [16, 8], strides = [1, 1]} : vector<16x96xf32> to vector<16x8xf32>
    %74 = vector.shape_cast %73 : vector<16x8xf32> to vector<2x8x8xf32>
    %75 = vector.extract_strided_slice %15 {offsets = [0, 48], sizes = [16, 8], strides = [1, 1]} : vector<16x96xf32> to vector<16x8xf32>
    %76 = vector.shape_cast %75 : vector<16x8xf32> to vector<2x8x8xf32>
    %77 = vector.extract_strided_slice %15 {offsets = [0, 80], sizes = [16, 8], strides = [1, 1]} : vector<16x96xf32> to vector<16x8xf32>
    %78 = vector.shape_cast %77 : vector<16x8xf32> to vector<2x8x8xf32>
    %79 = arith.truncf %74 : vector<2x8x8xf32> to vector<2x8x8xbf16>
    %80 = arith.truncf %76 : vector<2x8x8xf32> to vector<2x8x8xbf16>
    "tpu.trace_start"() <{level = 10 : i32, message = "bnd,bmd->bnm"}> : () -> ()
    %cst_27 = arith.constant dense<0.000000e+00> : vector<2x8x8xf32>
    %81 = tpu.matmul %79, %80, %cst_27 {dimension_numbers = #tpu.dot_dimension_numbers<[2], [2], [1], [1], [0, 0, 0, 1, 1, 1], [0], [0]>} : vector<2x8x8xbf16>, vector<2x8x8xbf16>, vector<2x8x8xf32> -> vector<2x8x8xf32>
    "tpu.trace_stop"() : () -> ()
    %cst_28 = arith.constant dense<0xFF800000> : vector<2x8xf32>
    %82 = vector.multi_reduction <maximumf>, %81, %cst_28 [2] : vector<2x8x8xf32> to vector<2x8xf32>
    %83 = vector.shape_cast %82 : vector<2x8xf32> to vector<2x8x1xf32>
    %84 = vector.broadcast %83 : vector<2x8x1xf32> to vector<2x8x8xf32>
    %85 = arith.subf %81, %84 : vector<2x8x8xf32>
    %86 = math.exp %85 : vector<2x8x8xf32>
    %cst_29 = arith.constant dense<0.000000e+00> : vector<2x8xf32>
    %87 = vector.multi_reduction <add>, %86, %cst_29 [2] : vector<2x8x8xf32> to vector<2x8xf32>
    %88 = vector.shape_cast %87 : vector<2x8xf32> to vector<2x8x1xf32>
    %89 = tpu.reciprocal %88 {approx = true} : vector<2x8x1xf32> -> vector<2x8x1xf32>
    %90 = vector.broadcast %89 : vector<2x8x1xf32> to vector<2x8x8xf32>
    %91 = arith.mulf %86, %90 : vector<2x8x8xf32>
    %92 = arith.truncf %91 : vector<2x8x8xf32> to vector<2x8x8xbf16>
    %93 = arith.truncf %78 : vector<2x8x8xf32> to vector<2x8x8xbf16>
    "tpu.trace_start"() <{level = 10 : i32, message = "bnm,bmd->bnd"}> : () -> ()
    %cst_30 = arith.constant dense<0.000000e+00> : vector<2x8x8xf32>
    %94 = tpu.matmul %92, %93, %cst_30 {dimension_numbers = #tpu.dot_dimension_numbers<[2], [1], [1], [2], [0, 0, 0, 1, 1, 2], [0], [0]>} : vector<2x8x8xbf16>, vector<2x8x8xbf16>, vector<2x8x8xf32> -> vector<2x8x8xf32>
    "tpu.trace_stop"() : () -> ()
    %95 = vector.shape_cast %94 : vector<2x8x8xf32> to vector<16x8xf32>
    %96 = arith.truncf %95 : vector<16x8xf32> to vector<16x8xbf16>
    %c2 = arith.constant 2 : index
    %c0_31 = arith.constant 0 : index
    %c0_32 = arith.constant 0 : index
    %97 = vector.load %arg4[%c2, %c0_31, %c0_32] : memref<8x8x32xbf16, #tpu.memory_space<vmem>>, vector<1x8x32xbf16>
    %98 = vector.shape_cast %97 : vector<1x8x32xbf16> to vector<8x32xbf16>
    %cst_33 = arith.constant dense<0.000000e+00> : vector<16x32xf32>
    %99 = tpu.matmul %96, %98, %cst_33 {dimension_numbers = #tpu.dot_dimension_numbers<[1], [0], [0], [1], [0, 0, 1, 1], [], []>} : vector<16x8xbf16>, vector<8x32xbf16>, vector<16x32xf32> -> vector<16x32xf32>
    %100 = arith.addf %72, %99 : vector<16x32xf32>
    %101 = vector.extract_strided_slice %15 {offsets = [0, 24], sizes = [16, 8], strides = [1, 1]} : vector<16x96xf32> to vector<16x8xf32>
    %102 = vector.shape_cast %101 : vector<16x8xf32> to vector<2x8x8xf32>
    %103 = vector.extract_strided_slice %15 {offsets = [0, 56], sizes = [16, 8], strides = [1, 1]} : vector<16x96xf32> to vector<16x8xf32>
    %104 = vector.shape_cast %103 : vector<16x8xf32> to vector<2x8x8xf32>
    %105 = vector.extract_strided_slice %15 {offsets = [0, 88], sizes = [16, 8], strides = [1, 1]} : vector<16x96xf32> to vector<16x8xf32>
    %106 = vector.shape_cast %105 : vector<16x8xf32> to vector<2x8x8xf32>
    %107 = arith.truncf %102 : vector<2x8x8xf32> to vector<2x8x8xbf16>
    %108 = arith.truncf %104 : vector<2x8x8xf32> to vector<2x8x8xbf16>
    "tpu.trace_start"() <{level = 10 : i32, message = "bnd,bmd->bnm"}> : () -> ()
    %cst_34 = arith.constant dense<0.000000e+00> : vector<2x8x8xf32>
    %109 = tpu.matmul %107, %108, %cst_34 {dimension_numbers = #tpu.dot_dimension_numbers<[2], [2], [1], [1], [0, 0, 0, 1, 1, 1], [0], [0]>} : vector<2x8x8xbf16>, vector<2x8x8xbf16>, vector<2x8x8xf32> -> vector<2x8x8xf32>
    "tpu.trace_stop"() : () -> ()
    %cst_35 = arith.constant dense<0xFF800000> : vector<2x8xf32>
    %110 = vector.multi_reduction <maximumf>, %109, %cst_35 [2] : vector<2x8x8xf32> to vector<2x8xf32>
    %111 = vector.shape_cast %110 : vector<2x8xf32> to vector<2x8x1xf32>
    %112 = vector.broadcast %111 : vector<2x8x1xf32> to vector<2x8x8xf32>
    %113 = arith.subf %109, %112 : vector<2x8x8xf32>
    %114 = math.exp %113 : vector<2x8x8xf32>
    %cst_36 = arith.constant dense<0.000000e+00> : vector<2x8xf32>
    %115 = vector.multi_reduction <add>, %114, %cst_36 [2] : vector<2x8x8xf32> to vector<2x8xf32>
    %116 = vector.shape_cast %115 : vector<2x8xf32> to vector<2x8x1xf32>
    %117 = tpu.reciprocal %116 {approx = true} : vector<2x8x1xf32> -> vector<2x8x1xf32>
    %118 = vector.broadcast %117 : vector<2x8x1xf32> to vector<2x8x8xf32>
    %119 = arith.mulf %114, %118 : vector<2x8x8xf32>
    %120 = arith.truncf %119 : vector<2x8x8xf32> to vector<2x8x8xbf16>
    %121 = arith.truncf %106 : vector<2x8x8xf32> to vector<2x8x8xbf16>
    "tpu.trace_start"() <{level = 10 : i32, message = "bnm,bmd->bnd"}> : () -> ()
    %cst_37 = arith.constant dense<0.000000e+00> : vector<2x8x8xf32>
    %122 = tpu.matmul %120, %121, %cst_37 {dimension_numbers = #tpu.dot_dimension_numbers<[2], [1], [1], [2], [0, 0, 0, 1, 1, 2], [0], [0]>} : vector<2x8x8xbf16>, vector<2x8x8xbf16>, vector<2x8x8xf32> -> vector<2x8x8xf32>
    "tpu.trace_stop"() : () -> ()
    %123 = vector.shape_cast %122 : vector<2x8x8xf32> to vector<16x8xf32>
    %124 = arith.truncf %123 : vector<16x8xf32> to vector<16x8xbf16>
    %c3 = arith.constant 3 : index
    %c0_38 = arith.constant 0 : index
    %c0_39 = arith.constant 0 : index
    %125 = vector.load %arg4[%c3, %c0_38, %c0_39] : memref<8x8x32xbf16, #tpu.memory_space<vmem>>, vector<1x8x32xbf16>
    %126 = vector.shape_cast %125 : vector<1x8x32xbf16> to vector<8x32xbf16>
    %cst_40 = arith.constant dense<0.000000e+00> : vector<16x32xf32>
    %127 = tpu.matmul %124, %126, %cst_40 {dimension_numbers = #tpu.dot_dimension_numbers<[1], [0], [0], [1], [0, 0, 1, 1], [], []>} : vector<16x8xbf16>, vector<8x32xbf16>, vector<16x32xf32> -> vector<16x32xf32>
    %128 = arith.addf %100, %127 : vector<16x32xf32>
    %129 = vector.broadcast %6 : vector<1x32xf32> to vector<16x32xf32>
    %130 = arith.addf %128, %129 : vector<16x32xf32>
    %131 = arith.addf %3, %130 : vector<16x32xf32>
    %132 = vector.shape_cast %131 : vector<16x32xf32> to vector<2x8x32xf32>
    %cst_41 = arith.constant dense<0.000000e+00> : vector<2x32xf32>
    %133 = vector.multi_reduction <add>, %132, %cst_41 [1] : vector<2x8x32xf32> to vector<2x32xf32>
    %134 = vector.shape_cast %133 : vector<2x32xf32> to vector<2x1x32xf32>
    %cst_42 = arith.constant 8.000000e+00 : f32
    %135 = vector.broadcast %cst_42 : f32 to vector<2x1x32xf32>
    %136 = arith.divf %134, %135 : vector<2x1x32xf32>
    %137 = vector.broadcast %136 : vector<2x1x32xf32> to vector<2x8x32xf32>
    %138 = arith.subf %132, %137 : vector<2x8x32xf32>
    %139 = arith.mulf %138, %138 : vector<2x8x32xf32>
    %cst_43 = arith.constant dense<0.000000e+00> : vector<2x32xf32>
    %140 = vector.multi_reduction <add>, %139, %cst_43 [1] : vector<2x8x32xf32> to vector<2x32xf32>
    %141 = vector.shape_cast %140 : vector<2x32xf32> to vector<2x1x32xf32>
    %cst_44 = arith.constant 8.000000e+00 : f32
    %142 = vector.broadcast %cst_44 : f32 to vector<2x1x32xf32>
    %143 = arith.divf %141, %142 : vector<2x1x32xf32>
    %cst_45 = arith.constant 9.99999974E-6 : f32
    %144 = vector.broadcast %cst_45 : f32 to vector<2x1x32xf32>
    %145 = arith.addf %143, %144 : vector<2x1x32xf32>
    %146 = math.rsqrt %145 : vector<2x1x32xf32>
    %147 = vector.broadcast %146 : vector<2x1x32xf32> to vector<2x8x32xf32>
    %148 = arith.mulf %138, %147 : vector<2x8x32xf32>
    %149 = vector.shape_cast %7 : vector<1x32xf32> to vector<1x1x32xf32>
    %150 = vector.broadcast %149 : vector<1x1x32xf32> to vector<2x8x32xf32>
    %151 = arith.mulf %148, %150 : vector<2x8x32xf32>
    %152 = vector.shape_cast %8 : vector<1x32xf32> to vector<1x1x32xf32>
    %153 = vector.broadcast %152 : vector<1x1x32xf32> to vector<2x8x32xf32>
    %154 = arith.addf %151, %153 : vector<2x8x32xf32>
    %155 = vector.shape_cast %154 : vector<2x8x32xf32> to vector<16x32xf32>
    %156 = arith.truncf %155 : vector<16x32xf32> to vector<16x32xbf16>
    %c0_46 = arith.constant 0 : index
    %c0_47 = arith.constant 0 : index
    %c0_48 = arith.constant 0 : index
    %157 = vector.load %arg5[%c0_46, %c0_47, %c0_48] : memref<2x32x64xbf16, #tpu.memory_space<vmem>>, vector<1x32x64xbf16>
    %158 = vector.shape_cast %157 : vector<1x32x64xbf16> to vector<32x64xbf16>
    %cst_49 = arith.constant dense<0.000000e+00> : vector<16x64xf32>
    %159 = tpu.matmul %156, %158, %cst_49 {dimension_numbers = #tpu.dot_dimension_numbers<[1], [0], [0], [1], [0, 0, 1, 1], [], []>} : vector<16x32xbf16>, vector<32x64xbf16>, vector<16x64xf32> -> vector<16x64xf32>
    %c0_50 = arith.constant 0 : index
    %c0_51 = arith.constant 0 : index
    %c0_52 = arith.constant 0 : index
    %160 = vector.load %arg7[%c0_50, %c0_51, %c0_52] : memref<2x1x64xf32, #tpu.memory_space<vmem>>, vector<1x1x64xf32>
    %161 = vector.shape_cast %160 : vector<1x1x64xf32> to vector<1x64xf32>
    %162 = vector.broadcast %161 : vector<1x64xf32> to vector<16x64xf32>
    %163 = arith.addf %159, %162 : vector<16x64xf32>
    %cst_53 = arith.constant 0.000000e+00 : f32
    %164 = vector.broadcast %cst_53 : f32 to vector<16x64xf32>
    %165 = arith.maximumf %163, %164 : vector<16x64xf32>
    %166 = arith.truncf %165 : vector<16x64xf32> to vector<16x64xbf16>
    %c0_54 = arith.constant 0 : index
    %c0_55 = arith.constant 0 : index
    %c0_56 = arith.constant 0 : index
    %167 = vector.load %arg6[%c0_54, %c0_55, %c0_56] : memref<2x64x32xbf16, #tpu.memory_space<vmem>>, vector<1x64x32xbf16>
    %168 = vector.shape_cast %167 : vector<1x64x32xbf16> to vector<64x32xbf16>
    %cst_57 = arith.constant dense<0.000000e+00> : vector<16x32xf32>
    %169 = tpu.matmul %166, %168, %cst_57 {dimension_numbers = #tpu.dot_dimension_numbers<[1], [0], [0], [1], [0, 0, 1, 1], [], []>} : vector<16x64xbf16>, vector<64x32xbf16>, vector<16x32xf32> -> vector<16x32xf32>
    %170 = vector.broadcast %9 : vector<1x32xf32> to vector<16x32xf32>
    %171 = arith.addf %169, %170 : vector<16x32xf32>
    %172 = arith.addf %155, %171 : vector<16x32xf32>
    %173 = vector.shape_cast %172 : vector<16x32xf32> to vector<2x8x32xf32>
    %cst_58 = arith.constant dense<0.000000e+00> : vector<2x32xf32>
    %174 = vector.multi_reduction <add>, %173, %cst_58 [1] : vector<2x8x32xf32> to vector<2x32xf32>
    %175 = vector.shape_cast %174 : vector<2x32xf32> to vector<2x1x32xf32>
    %cst_59 = arith.constant 8.000000e+00 : f32
    %176 = vector.broadcast %cst_59 : f32 to vector<2x1x32xf32>
    %177 = arith.divf %175, %176 : vector<2x1x32xf32>
    %178 = vector.broadcast %177 : vector<2x1x32xf32> to vector<2x8x32xf32>
    %179 = arith.subf %173, %178 : vector<2x8x32xf32>
    %180 = arith.mulf %179, %179 : vector<2x8x32xf32>
    %cst_60 = arith.constant dense<0.000000e+00> : vector<2x32xf32>
    %181 = vector.multi_reduction <add>, %180, %cst_60 [1] : vector<2x8x32xf32> to vector<2x32xf32>
    %182 = vector.shape_cast %181 : vector<2x32xf32> to vector<2x1x32xf32>
    %cst_61 = arith.constant 8.000000e+00 : f32
    %183 = vector.broadcast %cst_61 : f32 to vector<2x1x32xf32>
    %184 = arith.divf %182, %183 : vector<2x1x32xf32>
    %cst_62 = arith.constant 9.99999974E-6 : f32
    %185 = vector.broadcast %cst_62 : f32 to vector<2x1x32xf32>
    %186 = arith.addf %184, %185 : vector<2x1x32xf32>
    %187 = math.rsqrt %186 : vector<2x1x32xf32>
    %188 = vector.broadcast %187 : vector<2x1x32xf32> to vector<2x8x32xf32>
    %189 = arith.mulf %179, %188 : vector<2x8x32xf32>
    %190 = vector.shape_cast %10 : vector<1x32xf32> to vector<1x1x32xf32>
    %191 = vector.broadcast %190 : vector<1x1x32xf32> to vector<2x8x32xf32>
    %192 = arith.mulf %189, %191 : vector<2x8x32xf32>
    %193 = vector.shape_cast %11 : vector<1x32xf32> to vector<1x1x32xf32>
    %194 = vector.broadcast %193 : vector<1x1x32xf32> to vector<2x8x32xf32>
    %195 = arith.addf %192, %194 : vector<2x8x32xf32>
    %196 = vector.shape_cast %195 : vector<2x8x32xf32> to vector<16x32xf32>
    %c1_63 = arith.constant 1 : index
    %c0_64 = arith.constant 0 : index
    %c0_65 = arith.constant 0 : index
    %197 = vector.load %arg8[%c1_63, %c0_64, %c0_65] : memref<2x6x32xf32, #tpu.memory_space<vmem>>, vector<1x6x32xf32>
    %198 = vector.shape_cast %197 : vector<1x6x32xf32> to vector<6x32xf32>
    %199 = vector.extract_strided_slice %198 {offsets = [0, 0], sizes = [1, 32], strides = [1, 1]} : vector<6x32xf32> to vector<1x32xf32>
    %200 = vector.extract_strided_slice %198 {offsets = [1, 0], sizes = [1, 32], strides = [1, 1]} : vector<6x32xf32> to vector<1x32xf32>
    %201 = vector.extract_strided_slice %198 {offsets = [2, 0], sizes = [1, 32], strides = [1, 1]} : vector<6x32xf32> to vector<1x32xf32>
    %202 = vector.extract_strided_slice %198 {offsets = [3, 0], sizes = [1, 32], strides = [1, 1]} : vector<6x32xf32> to vector<1x32xf32>
    %203 = vector.extract_strided_slice %198 {offsets = [4, 0], sizes = [1, 32], strides = [1, 1]} : vector<6x32xf32> to vector<1x32xf32>
    %204 = vector.extract_strided_slice %198 {offsets = [5, 0], sizes = [1, 32], strides = [1, 1]} : vector<6x32xf32> to vector<1x32xf32>
    %205 = arith.truncf %196 : vector<16x32xf32> to vector<16x32xbf16>
    %c1_66 = arith.constant 1 : index
    %c0_67 = arith.constant 0 : index
    %c0_68 = arith.constant 0 : index
    %206 = vector.load %arg3[%c1_66, %c0_67, %c0_68] : memref<2x32x96xbf16, #tpu.memory_space<vmem>>, vector<1x32x96xbf16>
    %207 = vector.shape_cast %206 : vector<1x32x96xbf16> to vector<32x96xbf16>
    %cst_69 = arith.constant dense<0.000000e+00> : vector<16x96xf32>
    %208 = tpu.matmul %205, %207, %cst_69 {dimension_numbers = #tpu.dot_dimension_numbers<[1], [0], [0], [1], [0, 0, 1, 1], [], []>} : vector<16x32xbf16>, vector<32x96xbf16>, vector<16x96xf32> -> vector<16x96xf32>
    %cst_70 = arith.constant 0.000000e+00 : f32
    %209 = vector.broadcast %cst_70 : f32 to vector<16x32xf32>
    %210 = vector.extract_strided_slice %208 {offsets = [0, 0], sizes = [16, 8], strides = [1, 1]} : vector<16x96xf32> to vector<16x8xf32>
    %211 = vector.shape_cast %210 : vector<16x8xf32> to vector<2x8x8xf32>
    %212 = vector.extract_strided_slice %208 {offsets = [0, 32], sizes = [16, 8], strides = [1, 1]} : vector<16x96xf32> to vector<16x8xf32>
    %213 = vector.shape_cast %212 : vector<16x8xf32> to vector<2x8x8xf32>
    %214 = vector.extract_strided_slice %208 {offsets = [0, 64], sizes = [16, 8], strides = [1, 1]} : vector<16x96xf32> to vector<16x8xf32>
    %215 = vector.shape_cast %214 : vector<16x8xf32> to vector<2x8x8xf32>
    %216 = arith.truncf %211 : vector<2x8x8xf32> to vector<2x8x8xbf16>
    %217 = arith.truncf %213 : vector<2x8x8xf32> to vector<2x8x8xbf16>
    "tpu.trace_start"() <{level = 10 : i32, message = "bnd,bmd->bnm"}> : () -> ()
    %cst_71 = arith.constant dense<0.000000e+00> : vector<2x8x8xf32>
    %218 = tpu.matmul %216, %217, %cst_71 {dimension_numbers = #tpu.dot_dimension_numbers<[2], [2], [1], [1], [0, 0, 0, 1, 1, 1], [0], [0]>} : vector<2x8x8xbf16>, vector<2x8x8xbf16>, vector<2x8x8xf32> -> vector<2x8x8xf32>
    "tpu.trace_stop"() : () -> ()
    %cst_72 = arith.constant dense<0xFF800000> : vector<2x8xf32>
    %219 = vector.multi_reduction <maximumf>, %218, %cst_72 [2] : vector<2x8x8xf32> to vector<2x8xf32>
    %220 = vector.shape_cast %219 : vector<2x8xf32> to vector<2x8x1xf32>
    %221 = vector.broadcast %220 : vector<2x8x1xf32> to vector<2x8x8xf32>
    %222 = arith.subf %218, %221 : vector<2x8x8xf32>
    %223 = math.exp %222 : vector<2x8x8xf32>
    %cst_73 = arith.constant dense<0.000000e+00> : vector<2x8xf32>
    %224 = vector.multi_reduction <add>, %223, %cst_73 [2] : vector<2x8x8xf32> to vector<2x8xf32>
    %225 = vector.shape_cast %224 : vector<2x8xf32> to vector<2x8x1xf32>
    %226 = tpu.reciprocal %225 {approx = true} : vector<2x8x1xf32> -> vector<2x8x1xf32>
    %227 = vector.broadcast %226 : vector<2x8x1xf32> to vector<2x8x8xf32>
    %228 = arith.mulf %223, %227 : vector<2x8x8xf32>
    %229 = arith.truncf %228 : vector<2x8x8xf32> to vector<2x8x8xbf16>
    %230 = arith.truncf %215 : vector<2x8x8xf32> to vector<2x8x8xbf16>
    "tpu.trace_start"() <{level = 10 : i32, message = "bnm,bmd->bnd"}> : () -> ()
    %cst_74 = arith.constant dense<0.000000e+00> : vector<2x8x8xf32>
    %231 = tpu.matmul %229, %230, %cst_74 {dimension_numbers = #tpu.dot_dimension_numbers<[2], [1], [1], [2], [0, 0, 0, 1, 1, 2], [0], [0]>} : vector<2x8x8xbf16>, vector<2x8x8xbf16>, vector<2x8x8xf32> -> vector<2x8x8xf32>
    "tpu.trace_stop"() : () -> ()
    %232 = vector.shape_cast %231 : vector<2x8x8xf32> to vector<16x8xf32>
    %233 = arith.truncf %232 : vector<16x8xf32> to vector<16x8xbf16>
    %c4 = arith.constant 4 : index
    %c0_75 = arith.constant 0 : index
    %c0_76 = arith.constant 0 : index
    %234 = vector.load %arg4[%c4, %c0_75, %c0_76] : memref<8x8x32xbf16, #tpu.memory_space<vmem>>, vector<1x8x32xbf16>
    %235 = vector.shape_cast %234 : vector<1x8x32xbf16> to vector<8x32xbf16>
    %cst_77 = arith.constant dense<0.000000e+00> : vector<16x32xf32>
    %236 = tpu.matmul %233, %235, %cst_77 {dimension_numbers = #tpu.dot_dimension_numbers<[1], [0], [0], [1], [0, 0, 1, 1], [], []>} : vector<16x8xbf16>, vector<8x32xbf16>, vector<16x32xf32> -> vector<16x32xf32>
    %237 = arith.addf %209, %236 : vector<16x32xf32>
    %238 = vector.extract_strided_slice %208 {offsets = [0, 8], sizes = [16, 8], strides = [1, 1]} : vector<16x96xf32> to vector<16x8xf32>
    %239 = vector.shape_cast %238 : vector<16x8xf32> to vector<2x8x8xf32>
    %240 = vector.extract_strided_slice %208 {offsets = [0, 40], sizes = [16, 8], strides = [1, 1]} : vector<16x96xf32> to vector<16x8xf32>
    %241 = vector.shape_cast %240 : vector<16x8xf32> to vector<2x8x8xf32>
    %242 = vector.extract_strided_slice %208 {offsets = [0, 72], sizes = [16, 8], strides = [1, 1]} : vector<16x96xf32> to vector<16x8xf32>
    %243 = vector.shape_cast %242 : vector<16x8xf32> to vector<2x8x8xf32>
    %244 = arith.truncf %239 : vector<2x8x8xf32> to vector<2x8x8xbf16>
    %245 = arith.truncf %241 : vector<2x8x8xf32> to vector<2x8x8xbf16>
    "tpu.trace_start"() <{level = 10 : i32, message = "bnd,bmd->bnm"}> : () -> ()
    %cst_78 = arith.constant dense<0.000000e+00> : vector<2x8x8xf32>
    %246 = tpu.matmul %244, %245, %cst_78 {dimension_numbers = #tpu.dot_dimension_numbers<[2], [2], [1], [1], [0, 0, 0, 1, 1, 1], [0], [0]>} : vector<2x8x8xbf16>, vector<2x8x8xbf16>, vector<2x8x8xf32> -> vector<2x8x8xf32>
    "tpu.trace_stop"() : () -> ()
    %cst_79 = arith.constant dense<0xFF800000> : vector<2x8xf32>
    %247 = vector.multi_reduction <maximumf>, %246, %cst_79 [2] : vector<2x8x8xf32> to vector<2x8xf32>
    %248 = vector.shape_cast %247 : vector<2x8xf32> to vector<2x8x1xf32>
    %249 = vector.broadcast %248 : vector<2x8x1xf32> to vector<2x8x8xf32>
    %250 = arith.subf %246, %249 : vector<2x8x8xf32>
    %251 = math.exp %250 : vector<2x8x8xf32>
    %cst_80 = arith.constant dense<0.000000e+00> : vector<2x8xf32>
    %252 = vector.multi_reduction <add>, %251, %cst_80 [2] : vector<2x8x8xf32> to vector<2x8xf32>
    %253 = vector.shape_cast %252 : vector<2x8xf32> to vector<2x8x1xf32>
    %254 = tpu.reciprocal %253 {approx = true} : vector<2x8x1xf32> -> vector<2x8x1xf32>
    %255 = vector.broadcast %254 : vector<2x8x1xf32> to vector<2x8x8xf32>
    %256 = arith.mulf %251, %255 : vector<2x8x8xf32>
    %257 = arith.truncf %256 : vector<2x8x8xf32> to vector<2x8x8xbf16>
    %258 = arith.truncf %243 : vector<2x8x8xf32> to vector<2x8x8xbf16>
    "tpu.trace_start"() <{level = 10 : i32, message = "bnm,bmd->bnd"}> : () -> ()
    %cst_81 = arith.constant dense<0.000000e+00> : vector<2x8x8xf32>
    %259 = tpu.matmul %257, %258, %cst_81 {dimension_numbers = #tpu.dot_dimension_numbers<[2], [1], [1], [2], [0, 0, 0, 1, 1, 2], [0], [0]>} : vector<2x8x8xbf16>, vector<2x8x8xbf16>, vector<2x8x8xf32> -> vector<2x8x8xf32>
    "tpu.trace_stop"() : () -> ()
    %260 = vector.shape_cast %259 : vector<2x8x8xf32> to vector<16x8xf32>
    %261 = arith.truncf %260 : vector<16x8xf32> to vector<16x8xbf16>
    %c5 = arith.constant 5 : index
    %c0_82 = arith.constant 0 : index
    %c0_83 = arith.constant 0 : index
    %262 = vector.load %arg4[%c5, %c0_82, %c0_83] : memref<8x8x32xbf16, #tpu.memory_space<vmem>>, vector<1x8x32xbf16>
    %263 = vector.shape_cast %262 : vector<1x8x32xbf16> to vector<8x32xbf16>
    %cst_84 = arith.constant dense<0.000000e+00> : vector<16x32xf32>
    %264 = tpu.matmul %261, %263, %cst_84 {dimension_numbers = #tpu.dot_dimension_numbers<[1], [0], [0], [1], [0, 0, 1, 1], [], []>} : vector<16x8xbf16>, vector<8x32xbf16>, vector<16x32xf32> -> vector<16x32xf32>
    %265 = arith.addf %237, %264 : vector<16x32xf32>
    %266 = vector.extract_strided_slice %208 {offsets = [0, 16], sizes = [16, 8], strides = [1, 1]} : vector<16x96xf32> to vector<16x8xf32>
    %267 = vector.shape_cast %266 : vector<16x8xf32> to vector<2x8x8xf32>
    %268 = vector.extract_strided_slice %208 {offsets = [0, 48], sizes = [16, 8], strides = [1, 1]} : vector<16x96xf32> to vector<16x8xf32>
    %269 = vector.shape_cast %268 : vector<16x8xf32> to vector<2x8x8xf32>
    %270 = vector.extract_strided_slice %208 {offsets = [0, 80], sizes = [16, 8], strides = [1, 1]} : vector<16x96xf32> to vector<16x8xf32>
    %271 = vector.shape_cast %270 : vector<16x8xf32> to vector<2x8x8xf32>
    %272 = arith.truncf %267 : vector<2x8x8xf32> to vector<2x8x8xbf16>
    %273 = arith.truncf %269 : vector<2x8x8xf32> to vector<2x8x8xbf16>
    "tpu.trace_start"() <{level = 10 : i32, message = "bnd,bmd->bnm"}> : () -> ()
    %cst_85 = arith.constant dense<0.000000e+00> : vector<2x8x8xf32>
    %274 = tpu.matmul %272, %273, %cst_85 {dimension_numbers = #tpu.dot_dimension_numbers<[2], [2], [1], [1], [0, 0, 0, 1, 1, 1], [0], [0]>} : vector<2x8x8xbf16>, vector<2x8x8xbf16>, vector<2x8x8xf32> -> vector<2x8x8xf32>
    "tpu.trace_stop"() : () -> ()
    %cst_86 = arith.constant dense<0xFF800000> : vector<2x8xf32>
    %275 = vector.multi_reduction <maximumf>, %274, %cst_86 [2] : vector<2x8x8xf32> to vector<2x8xf32>
    %276 = vector.shape_cast %275 : vector<2x8xf32> to vector<2x8x1xf32>
    %277 = vector.broadcast %276 : vector<2x8x1xf32> to vector<2x8x8xf32>
    %278 = arith.subf %274, %277 : vector<2x8x8xf32>
    %279 = math.exp %278 : vector<2x8x8xf32>
    %cst_87 = arith.constant dense<0.000000e+00> : vector<2x8xf32>
    %280 = vector.multi_reduction <add>, %279, %cst_87 [2] : vector<2x8x8xf32> to vector<2x8xf32>
    %281 = vector.shape_cast %280 : vector<2x8xf32> to vector<2x8x1xf32>
    %282 = tpu.reciprocal %281 {approx = true} : vector<2x8x1xf32> -> vector<2x8x1xf32>
    %283 = vector.broadcast %282 : vector<2x8x1xf32> to vector<2x8x8xf32>
    %284 = arith.mulf %279, %283 : vector<2x8x8xf32>
    %285 = arith.truncf %284 : vector<2x8x8xf32> to vector<2x8x8xbf16>
    %286 = arith.truncf %271 : vector<2x8x8xf32> to vector<2x8x8xbf16>
    "tpu.trace_start"() <{level = 10 : i32, message = "bnm,bmd->bnd"}> : () -> ()
    %cst_88 = arith.constant dense<0.000000e+00> : vector<2x8x8xf32>
    %287 = tpu.matmul %285, %286, %cst_88 {dimension_numbers = #tpu.dot_dimension_numbers<[2], [1], [1], [2], [0, 0, 0, 1, 1, 2], [0], [0]>} : vector<2x8x8xbf16>, vector<2x8x8xbf16>, vector<2x8x8xf32> -> vector<2x8x8xf32>
    "tpu.trace_stop"() : () -> ()
    %288 = vector.shape_cast %287 : vector<2x8x8xf32> to vector<16x8xf32>
    %289 = arith.truncf %288 : vector<16x8xf32> to vector<16x8xbf16>
    %c6 = arith.constant 6 : index
    %c0_89 = arith.constant 0 : index
    %c0_90 = arith.constant 0 : index
    %290 = vector.load %arg4[%c6, %c0_89, %c0_90] : memref<8x8x32xbf16, #tpu.memory_space<vmem>>, vector<1x8x32xbf16>
    %291 = vector.shape_cast %290 : vector<1x8x32xbf16> to vector<8x32xbf16>
    %cst_91 = arith.constant dense<0.000000e+00> : vector<16x32xf32>
    %292 = tpu.matmul %289, %291, %cst_91 {dimension_numbers = #tpu.dot_dimension_numbers<[1], [0], [0], [1], [0, 0, 1, 1], [], []>} : vector<16x8xbf16>, vector<8x32xbf16>, vector<16x32xf32> -> vector<16x32xf32>
    %293 = arith.addf %265, %292 : vector<16x32xf32>
    %294 = vector.extract_strided_slice %208 {offsets = [0, 24], sizes = [16, 8], strides = [1, 1]} : vector<16x96xf32> to vector<16x8xf32>
    %295 = vector.shape_cast %294 : vector<16x8xf32> to vector<2x8x8xf32>
    %296 = vector.extract_strided_slice %208 {offsets = [0, 56], sizes = [16, 8], strides = [1, 1]} : vector<16x96xf32> to vector<16x8xf32>
    %297 = vector.shape_cast %296 : vector<16x8xf32> to vector<2x8x8xf32>
    %298 = vector.extract_strided_slice %208 {offsets = [0, 88], sizes = [16, 8], strides = [1, 1]} : vector<16x96xf32> to vector<16x8xf32>
    %299 = vector.shape_cast %298 : vector<16x8xf32> to vector<2x8x8xf32>
    %300 = arith.truncf %295 : vector<2x8x8xf32> to vector<2x8x8xbf16>
    %301 = arith.truncf %297 : vector<2x8x8xf32> to vector<2x8x8xbf16>
    "tpu.trace_start"() <{level = 10 : i32, message = "bnd,bmd->bnm"}> : () -> ()
    %cst_92 = arith.constant dense<0.000000e+00> : vector<2x8x8xf32>
    %302 = tpu.matmul %300, %301, %cst_92 {dimension_numbers = #tpu.dot_dimension_numbers<[2], [2], [1], [1], [0, 0, 0, 1, 1, 1], [0], [0]>} : vector<2x8x8xbf16>, vector<2x8x8xbf16>, vector<2x8x8xf32> -> vector<2x8x8xf32>
    "tpu.trace_stop"() : () -> ()
    %cst_93 = arith.constant dense<0xFF800000> : vector<2x8xf32>
    %303 = vector.multi_reduction <maximumf>, %302, %cst_93 [2] : vector<2x8x8xf32> to vector<2x8xf32>
    %304 = vector.shape_cast %303 : vector<2x8xf32> to vector<2x8x1xf32>
    %305 = vector.broadcast %304 : vector<2x8x1xf32> to vector<2x8x8xf32>
    %306 = arith.subf %302, %305 : vector<2x8x8xf32>
    %307 = math.exp %306 : vector<2x8x8xf32>
    %cst_94 = arith.constant dense<0.000000e+00> : vector<2x8xf32>
    %308 = vector.multi_reduction <add>, %307, %cst_94 [2] : vector<2x8x8xf32> to vector<2x8xf32>
    %309 = vector.shape_cast %308 : vector<2x8xf32> to vector<2x8x1xf32>
    %310 = tpu.reciprocal %309 {approx = true} : vector<2x8x1xf32> -> vector<2x8x1xf32>
    %311 = vector.broadcast %310 : vector<2x8x1xf32> to vector<2x8x8xf32>
    %312 = arith.mulf %307, %311 : vector<2x8x8xf32>
    %313 = arith.truncf %312 : vector<2x8x8xf32> to vector<2x8x8xbf16>
    %314 = arith.truncf %299 : vector<2x8x8xf32> to vector<2x8x8xbf16>
    "tpu.trace_start"() <{level = 10 : i32, message = "bnm,bmd->bnd"}> : () -> ()
    %cst_95 = arith.constant dense<0.000000e+00> : vector<2x8x8xf32>
    %315 = tpu.matmul %313, %314, %cst_95 {dimension_numbers = #tpu.dot_dimension_numbers<[2], [1], [1], [2], [0, 0, 0, 1, 1, 2], [0], [0]>} : vector<2x8x8xbf16>, vector<2x8x8xbf16>, vector<2x8x8xf32> -> vector<2x8x8xf32>
    "tpu.trace_stop"() : () -> ()
    %316 = vector.shape_cast %315 : vector<2x8x8xf32> to vector<16x8xf32>
    %317 = arith.truncf %316 : vector<16x8xf32> to vector<16x8xbf16>
    %c7 = arith.constant 7 : index
    %c0_96 = arith.constant 0 : index
    %c0_97 = arith.constant 0 : index
    %318 = vector.load %arg4[%c7, %c0_96, %c0_97] : memref<8x8x32xbf16, #tpu.memory_space<vmem>>, vector<1x8x32xbf16>
    %319 = vector.shape_cast %318 : vector<1x8x32xbf16> to vector<8x32xbf16>
    %cst_98 = arith.constant dense<0.000000e+00> : vector<16x32xf32>
    %320 = tpu.matmul %317, %319, %cst_98 {dimension_numbers = #tpu.dot_dimension_numbers<[1], [0], [0], [1], [0, 0, 1, 1], [], []>} : vector<16x8xbf16>, vector<8x32xbf16>, vector<16x32xf32> -> vector<16x32xf32>
    %321 = arith.addf %293, %320 : vector<16x32xf32>
    %322 = vector.broadcast %199 : vector<1x32xf32> to vector<16x32xf32>
    %323 = arith.addf %321, %322 : vector<16x32xf32>
    %324 = arith.addf %196, %323 : vector<16x32xf32>
    %325 = vector.shape_cast %324 : vector<16x32xf32> to vector<2x8x32xf32>
    %cst_99 = arith.constant dense<0.000000e+00> : vector<2x32xf32>
    %326 = vector.multi_reduction <add>, %325, %cst_99 [1] : vector<2x8x32xf32> to vector<2x32xf32>
    %327 = vector.shape_cast %326 : vector<2x32xf32> to vector<2x1x32xf32>
    %cst_100 = arith.constant 8.000000e+00 : f32
    %328 = vector.broadcast %cst_100 : f32 to vector<2x1x32xf32>
    %329 = arith.divf %327, %328 : vector<2x1x32xf32>
    %330 = vector.broadcast %329 : vector<2x1x32xf32> to vector<2x8x32xf32>
    %331 = arith.subf %325, %330 : vector<2x8x32xf32>
    %332 = arith.mulf %331, %331 : vector<2x8x32xf32>
    %cst_101 = arith.constant dense<0.000000e+00> : vector<2x32xf32>
    %333 = vector.multi_reduction <add>, %332, %cst_101 [1] : vector<2x8x32xf32> to vector<2x32xf32>
    %334 = vector.shape_cast %333 : vector<2x32xf32> to vector<2x1x32xf32>
    %cst_102 = arith.constant 8.000000e+00 : f32
    %335 = vector.broadcast %cst_102 : f32 to vector<2x1x32xf32>
    %336 = arith.divf %334, %335 : vector<2x1x32xf32>
    %cst_103 = arith.constant 9.99999974E-6 : f32
    %337 = vector.broadcast %cst_103 : f32 to vector<2x1x32xf32>
    %338 = arith.addf %336, %337 : vector<2x1x32xf32>
    %339 = math.rsqrt %338 : vector<2x1x32xf32>
    %340 = vector.broadcast %339 : vector<2x1x32xf32> to vector<2x8x32xf32>
    %341 = arith.mulf %331, %340 : vector<2x8x32xf32>
    %342 = vector.shape_cast %200 : vector<1x32xf32> to vector<1x1x32xf32>
    %343 = vector.broadcast %342 : vector<1x1x32xf32> to vector<2x8x32xf32>
    %344 = arith.mulf %341, %343 : vector<2x8x32xf32>
    %345 = vector.shape_cast %201 : vector<1x32xf32> to vector<1x1x32xf32>
    %346 = vector.broadcast %345 : vector<1x1x32xf32> to vector<2x8x32xf32>
    %347 = arith.addf %344, %346 : vector<2x8x32xf32>
    %348 = vector.shape_cast %347 : vector<2x8x32xf32> to vector<16x32xf32>
    %349 = arith.truncf %348 : vector<16x32xf32> to vector<16x32xbf16>
    %c1_104 = arith.constant 1 : index
    %c0_105 = arith.constant 0 : index
    %c0_106 = arith.constant 0 : index
    %350 = vector.load %arg5[%c1_104, %c0_105, %c0_106] : memref<2x32x64xbf16, #tpu.memory_space<vmem>>, vector<1x32x64xbf16>
    %351 = vector.shape_cast %350 : vector<1x32x64xbf16> to vector<32x64xbf16>
    %cst_107 = arith.constant dense<0.000000e+00> : vector<16x64xf32>
    %352 = tpu.matmul %349, %351, %cst_107 {dimension_numbers = #tpu.dot_dimension_numbers<[1], [0], [0], [1], [0, 0, 1, 1], [], []>} : vector<16x32xbf16>, vector<32x64xbf16>, vector<16x64xf32> -> vector<16x64xf32>
    %c1_108 = arith.constant 1 : index
    %c0_109 = arith.constant 0 : index
    %c0_110 = arith.constant 0 : index
    %353 = vector.load %arg7[%c1_108, %c0_109, %c0_110] : memref<2x1x64xf32, #tpu.memory_space<vmem>>, vector<1x1x64xf32>
    %354 = vector.shape_cast %353 : vector<1x1x64xf32> to vector<1x64xf32>
    %355 = vector.broadcast %354 : vector<1x64xf32> to vector<16x64xf32>
    %356 = arith.addf %352, %355 : vector<16x64xf32>
    %cst_111 = arith.constant 0.000000e+00 : f32
    %357 = vector.broadcast %cst_111 : f32 to vector<16x64xf32>
    %358 = arith.maximumf %356, %357 : vector<16x64xf32>
    %359 = arith.truncf %358 : vector<16x64xf32> to vector<16x64xbf16>
    %c1_112 = arith.constant 1 : index
    %c0_113 = arith.constant 0 : index
    %c0_114 = arith.constant 0 : index
    %360 = vector.load %arg6[%c1_112, %c0_113, %c0_114] : memref<2x64x32xbf16, #tpu.memory_space<vmem>>, vector<1x64x32xbf16>
    %361 = vector.shape_cast %360 : vector<1x64x32xbf16> to vector<64x32xbf16>
    %cst_115 = arith.constant dense<0.000000e+00> : vector<16x32xf32>
    %362 = tpu.matmul %359, %361, %cst_115 {dimension_numbers = #tpu.dot_dimension_numbers<[1], [0], [0], [1], [0, 0, 1, 1], [], []>} : vector<16x64xbf16>, vector<64x32xbf16>, vector<16x32xf32> -> vector<16x32xf32>
    %363 = vector.broadcast %202 : vector<1x32xf32> to vector<16x32xf32>
    %364 = arith.addf %362, %363 : vector<16x32xf32>
    %365 = arith.addf %348, %364 : vector<16x32xf32>
    %366 = vector.shape_cast %365 : vector<16x32xf32> to vector<2x8x32xf32>
    %cst_116 = arith.constant dense<0.000000e+00> : vector<2x32xf32>
    %367 = vector.multi_reduction <add>, %366, %cst_116 [1] : vector<2x8x32xf32> to vector<2x32xf32>
    %368 = vector.shape_cast %367 : vector<2x32xf32> to vector<2x1x32xf32>
    %cst_117 = arith.constant 8.000000e+00 : f32
    %369 = vector.broadcast %cst_117 : f32 to vector<2x1x32xf32>
    %370 = arith.divf %368, %369 : vector<2x1x32xf32>
    %371 = vector.broadcast %370 : vector<2x1x32xf32> to vector<2x8x32xf32>
    %372 = arith.subf %366, %371 : vector<2x8x32xf32>
    %373 = arith.mulf %372, %372 : vector<2x8x32xf32>
    %cst_118 = arith.constant dense<0.000000e+00> : vector<2x32xf32>
    %374 = vector.multi_reduction <add>, %373, %cst_118 [1] : vector<2x8x32xf32> to vector<2x32xf32>
    %375 = vector.shape_cast %374 : vector<2x32xf32> to vector<2x1x32xf32>
    %cst_119 = arith.constant 8.000000e+00 : f32
    %376 = vector.broadcast %cst_119 : f32 to vector<2x1x32xf32>
    %377 = arith.divf %375, %376 : vector<2x1x32xf32>
    %cst_120 = arith.constant 9.99999974E-6 : f32
    %378 = vector.broadcast %cst_120 : f32 to vector<2x1x32xf32>
    %379 = arith.addf %377, %378 : vector<2x1x32xf32>
    %380 = math.rsqrt %379 : vector<2x1x32xf32>
    %381 = vector.broadcast %380 : vector<2x1x32xf32> to vector<2x8x32xf32>
    %382 = arith.mulf %372, %381 : vector<2x8x32xf32>
    %383 = vector.shape_cast %203 : vector<1x32xf32> to vector<1x1x32xf32>
    %384 = vector.broadcast %383 : vector<1x1x32xf32> to vector<2x8x32xf32>
    %385 = arith.mulf %382, %384 : vector<2x8x32xf32>
    %386 = vector.shape_cast %204 : vector<1x32xf32> to vector<1x1x32xf32>
    %387 = vector.broadcast %386 : vector<1x1x32xf32> to vector<2x8x32xf32>
    %388 = arith.addf %385, %387 : vector<2x8x32xf32>
    %389 = vector.shape_cast %388 : vector<2x8x32xf32> to vector<16x32xf32>
    %390 = vector.shape_cast %389 : vector<16x32xf32> to vector<2x8x32xf32>
    %c0_121 = arith.constant 0 : index
    %c0_122 = arith.constant 0 : index
    %c0_123 = arith.constant 0 : index
    %391 = vector.load %arg9[%c0_121, %c0_122, %c0_123] : memref<2x8x32xf32, #tpu.memory_space<vmem>>, vector<2x8x32xf32>
    tpu.vector_store %arg9[%c0_121, %c0_122, %c0_123], %390 {strides = array<i32>} : memref<2x8x32xf32, #tpu.memory_space<vmem>>, vector<2x8x32xf32>,
    return
  }
  func.func @transform_0(%arg0: i32) -> (i32, i32, i32) {
    %c0_i32 = arith.constant 0 : i32
    %c0_i32_0 = arith.constant 0 : i32
    %c0_i32_1 = arith.constant 0 : i32
    return %arg0, %c0_i32, %c0_i32_0 : i32, i32, i32
  }
  func.func @transform_1(%arg0: i32) -> (i32, i32) {
    %c0_i32 = arith.constant 0 : i32
    %c0_i32_0 = arith.constant 0 : i32
    %c0_i32_1 = arith.constant 0 : i32
    return %c0_i32, %c0_i32_0 : i32, i32
  }
  func.func @transform_2(%arg0: i32) -> (i32, i32, i32) {
    %c0_i32 = arith.constant 0 : i32
    %c0_i32_0 = arith.constant 0 : i32
    %c0_i32_1 = arith.constant 0 : i32
    %c0_i32_2 = arith.constant 0 : i32
    return %c0_i32, %c0_i32_0, %c0_i32_1 : i32, i32, i32
  }
  func.func @transform_3(%arg0: i32) -> (i32, i32, i32) {
    %c0_i32 = arith.constant 0 : i32
    %c0_i32_0 = arith.constant 0 : i32
    %c0_i32_1 = arith.constant 0 : i32
    %c0_i32_2 = arith.constant 0 : i32
    return %c0_i32, %c0_i32_0, %c0_i32_1 : i32, i32, i32
  }
  func.func @transform_4(%arg0: i32) -> (i32, i32, i32) {
    %c0_i32 = arith.constant 0 : i32
    %c0_i32_0 = arith.constant 0 : i32
    %c0_i32_1 = arith.constant 0 : i32
    %c0_i32_2 = arith.constant 0 : i32
    return %c0_i32, %c0_i32_0, %c0_i32_1 : i32, i32, i32
  }
  func.func @transform_5(%arg0: i32) -> (i32, i32, i32) {
    %c0_i32 = arith.constant 0 : i32
    %c0_i32_0 = arith.constant 0 : i32
    %c0_i32_1 = arith.constant 0 : i32
    %c0_i32_2 = arith.constant 0 : i32
    return %c0_i32, %c0_i32_0, %c0_i32_1 : i32, i32, i32
  }
  func.func @transform_6(%arg0: i32) -> (i32, i32, i32) {
    %c0_i32 = arith.constant 0 : i32
    %c0_i32_0 = arith.constant 0 : i32
    %c0_i32_1 = arith.constant 0 : i32
    %c0_i32_2 = arith.constant 0 : i32
    return %c0_i32, %c0_i32_0, %c0_i32_1 : i32, i32, i32
  }
  func.func @transform_7(%arg0: i32) -> (i32, i32, i32) {
    %c0_i32 = arith.constant 0 : i32
    %c0_i32_0 = arith.constant 0 : i32
    %c0_i32_1 = arith.constant 0 : i32
    %c0_i32_2 = arith.constant 0 : i32
    return %c0_i32, %c0_i32_0, %c0_i32_1 : i32, i32, i32
  }
  func.func @transform_8(%arg0: i32) -> (i32, i32, i32) {
    %c0_i32 = arith.constant 0 : i32
    %c0_i32_0 = arith.constant 0 : i32
    %c0_i32_1 = arith.constant 0 : i32
    return %arg0, %c0_i32, %c0_i32_0 : i32, i32, i32
  }
}

</mosaic_0001>

<bundles_post_ra>
// kernel: tpu_custom_call.1
= control target key start
LH: loop header
LB: loop body
LE: loop exit
PB: predicated region body
PF: predicated region fallthrough
CT: control target
= control target key end

     0   :  { %13 = vsyncpa [#allocation3], 0  ;;  %s2600_s0 = inlined_call_operand.hbm [shape: f32[2,8,8], index: 0, kind: input, shape index: {}]   ;;  %s2601_s1 = inlined_call_operand.hbm [shape: f32[8,32], index: 1, kind: input, shape index: {}]   ;;  %s2602_s2 = inlined_call_operand.vmem [shape: bf16[2,32,96], index: 2, kind: input, shape index: {}]   ;;  %s2603_s3 = inlined_call_operand.vmem [shape: bf16[8,8,32], index: 3, kind: input, shape index: {}]   ;;  %s2604_s4 = inlined_call_operand.vmem [shape: bf16[2,32,64], index: 4, kind: input, shape index: {}]   ;;  %s2605_s5 = inlined_call_operand.vmem [shape: bf16[2,64,32], index: 5, kind: input, shape index: {}]   ;;  %s2606_s6 = inlined_call_operand.hbm [shape: f32[2,1,64], index: 6, kind: input, shape index: {}]   ;;  %s2607_s7 = inlined_call_operand.vmem [shape: f32[2,6,32], index: 7, kind: input, shape index: {}]   ;;  %s2608_s8 = inlined_call_operand.hbm [shape: f32[2,8,32], index: 8, kind: output, shape index: {}]  }
   0x1   :  { %14 = vsyncpa [#allocation6], 0  ;;  %s34_s29 = sshll.u32 %s2601_s1, 4  ;;  %s35_s29 = int_to_ptr.hbm [resolvable:$true] %s34_s29 }
   0x2   :  { %15 = vsyncpa [#allocation4], 0  ;;  %s2129_s30 = smov [#allocation5]   ;;  %s20_s12 = sshll.u32 %s2600_s0, 4  ;;  %s21_s12 = int_to_ptr.hbm [resolvable:$true] %s20_s12 }
   0x3   :  { %s36_s9 = sshll.u32 %s2129_s30, 4  ;;  %s2130_s13 = smov [#allocation2]   ;;  %s37_s9 = int_to_ptr.vmem [resolvable:$true] %s36_s9 }
   0x4   :  { %39 = dma.hbm_to_vmem [thread:$0]  %s35_s29, 128, %s37_s9, [#allocation6]  }
   0x5   :  { %s22_s14 = sshll.u32 %s2130_s13, 4  ;;  %s2131_s15 = smov 128   ;;  %s23_s14 = int_to_ptr.vmem [resolvable:$true] %s22_s14 }
   0x6   :  { %s2132_s16 = smov 8   ;;  %s52_s18 = sshll.u32 %s2606_s6, 4  ;;  %s53_s18 = int_to_ptr.hbm [resolvable:$true] %s52_s18 }
   0x7   :  { %28 = dma.hbm_to_vmem [thread:$0]  %s21_s12, 256, %s23_s14, [#allocation3], %s2131_s15, %s2131_s15, %s2132_s16  }
   0x8   :  { %s2133_s19 = smov [#allocation7]   ;;  %s2134_s0 = smov 16  }
   0x9   :  { %s54_s20 = sshll.u32 %s2133_s19, 4  ;;  %s2135_s21 = smov 1   ;;  %s55_s20 = int_to_ptr.vmem [resolvable:$true] %s54_s20 }
   0xa   :  { %60 = dma.hbm_to_vmem [thread:$0]  %s53_s18, 32, %s55_s20, [#allocation6], %s2134_s0, %s2134_s0, %s2135_s21  }
   0xb   :  { %2123 = dma.done.wait [#allocation3], 256  }
   0xc   :  { %2124 = vsyncadd [#allocation3], 4294967040 }
   0xd   :  { %2125 = dma.done.wait [#allocation6], 160  }
   0xe   :  { %2126 = vsyncadd [#allocation6], 4294967136  ;;  %vm79_vm0 = vcmask 64512   ;;  %v78_v0 = vld [vmem:[#allocation5] sm:$0xff]  ;;  %v76_v1 = vld [vmem:[#allocation2] sm:$0xff]  ;;  %vm127_vm1 = vcmask 261120  }
   0xf   :  { %101 = vmatpush.msra.mxu0 %v78_v0  ;;  %v77_v2 = vld [vmem:[#allocation2 + $0x8] sm:$0xff]  ;;  %v1907_v4 = vld [vmem:[%s2602_s2] sm:$0xff]  ;;  %s2136_s25 = smov 120   ;;  %s2137_s26 = smov 96   ;;  %vm224_vm2 = vcmask 1043456   ;;  %vm845_vm10 = vcmask 523264  }
  0x10   :  { %1771 = vmatmul.msk.f32.vlgmr.msra.gmra.mxu0 %vm79_vm0, %v76_v1  ;;  %v1908_v3 = vld [vmem:[%s2602_s2 + $0x8] sm:$0xff]  ;;  %s2138_s27 = smov 88   ;;  %s2139_s28 = smov 56   ;;  %v1790_v52 = vld [vmem:[%s2603_s3 + $0x4] sm:$0xf] }
  0x11   :  { %137 = vmatpush.bf16.msra.mxu1 %v1908_v3  ;;  %s2140_s29 = smov 64   ;;  %s2141_s30 = smov 112   ;;  %v383_v53 = vsel %vm224_vm2, %v1790_v52, 0  ;;  %v263_v63 = vld [vmem:[%s2603_s3] sm:$0xf] }
  0x12   :  { %s2142_s9 = smov 48   ;;  %s2143_s10 = smov 72   ;;  %v403_v0 = vsel %vm224_vm2, %v263_v63, 0 }
  0x13   :  { %s2144_s11 = smov 104   ;;  %s2145_s12 = smov 80  }
  0x14   :  { %s2146_s18 = smov 40   ;;  %s1757_s13 = sshll.u32 %s2608_s8, 4  ;;  %s1758_s13 = int_to_ptr.hbm [resolvable:$true] %s1757_s13 }
  0x15   :  { %138 = vmatpush.bf16.msra.mxu1 %v1907_v4 }
  0x18   :  { %1772 = vmatmul.msk.f32.gmra.mxu0 %vm79_vm0, %v77_v2 }
  0x8d   :  { %v2214_v5 = vpop.f32.mrf.mxu0 }
  0x95   :  { %v2216_v6 = vpop.f32.mrf.mxu0 }
  0x96   :  { %v110_v7 = vpack.c.bf16 %v2216_v6, %v2214_v5 }
  0x98   :  { %1781 = vmatmul.msk.bf16.vlgmr.msra.gmra.mxu1 %vm127_vm1, %v110_v7 }
 0x115   :  { %v140_v8 = vpop.f32.mrf.mxu1 }
 0x116   :  { %v145_v9 = vpack.c.bf16 %v140_v8, %v140_v8 }
 0x118   :  { %v148_v10 = vunpack.c.l.b16 %v145_v9 }
 0x11a   :  { %v2221_v11 = vpack.c.b16 %v148_v10, %v148_v10 }
 0x11c   :  { %264 = vrot.lane.b32.xlu1 %v2221_v11, %s2136_s25  ;;  %150 = vrot.lane.b32.xlu0 %v2221_v11, %s2137_s26 }
 0x11d   :  { %v142_v12 = vpop.f32.mrf.mxu1 }
 0x11e   :  { %v146_v13 = vpack.c.bf16 %v142_v12, %v142_v12 }
 0x120   :  { %v172_v14 = vunpack.c.l.b16 %v146_v13 }
 0x122   :  { %v2227_v15 = vpack.c.b16 %v172_v14, %v172_v14 }
 0x124   :  { %266 = vrot.lane.b32.xlu0 %v2221_v11, %s2138_s27  ;;  %289 = vrot.lane.b32.xlu2 %v2227_v15, %s2138_s27 }
 0x125   :  { %174 = vrot.lane.b32.xlu1 %v2227_v15, %s2137_s26 }
 0x12c   :  { %287 = vrot.lane.b32.xlu2 %v2227_v15, %s2136_s25 }
 0x17e   :  { %v290_v19 = vpop.permute.xlu2 %289 }
 0x17f   :  { %v295_v24 = vsel %vm79_vm0, %v290_v19, 0 }
 0x186   :  { %v288_v25 = vpop.permute.xlu2 %287 }
 0x18e   :  { %v265_v16 = vpop.permute.xlu1 %264  ;;  %v151_v17 = vpop.permute.xlu0 %150 }
 0x18f   :  { %v156_v18 = vsel %vm79_vm0, %v151_v17, 0 }
 0x190   :  { %165 = vmatpush.bf16.xpose.msra.mxu2 %v156_v18 }
 0x196   :  { %v267_v20 = vpop.permute.xlu0 %266 }
 0x197   :  { %v175_v21 = vpop.permute.xlu1 %174  ;;  %1782 = vmatmul.msk.bf16.vlgmr.msra.gmra.mxu2 %vm79_vm0, %v145_v9  ;;  %v272_v22 = vsel %vm79_vm0, %v267_v20, 0 }
 0x198   :  { %v180_v23 = vsel %vm79_vm0, %v175_v21, 0  ;;  %281 = vmatpush.bf16.xpose.msrb.mxu2 %v272_v22 }
 0x199   :  { %189 = vmatpush.bf16.xpose.msra.mxu3 %v180_v23 }
 0x1a0   :  { %1783 = vmatmul.msk.bf16.vlgmr.msra.gmra.mxu3 %vm79_vm0, %v146_v13  ;;  %392 = vmatpush.bf16.msra.mxu2 %v383_v53 }
 0x1a1   :  { %304 = vmatpush.bf16.xpose.msrb.mxu3 %v295_v24 }
 0x1a7   :  { %1786 = vmatmul.msk.bf16.vlgmr.msrb.gmra.mxu2 %vm79_vm0, %v265_v16 }
 0x1a9   :  { %412 = vmatpush.bf16.msra.mxu3 %v403_v0 }
 0x1b0   :  { %1787 = vmatmul.msk.bf16.vlgmr.msrb.gmra.mxu3 %vm79_vm0, %v288_v25 }
 0x21a   :  { %v167_v26 = vpop.f32.mrf.mxu2 }
 0x21b   :  { %v195_v27 = vsel %vm79_vm0, %v167_v26, -inf }
 0x21c   :  { %196 = vmax.xlane.f32.xlu0 %v195_v27 }
 0x222   :  { %v169_v28 = vpop.f32.mrf.mxu2 }
 0x223   :  { %v191_v29 = vpop.f32.mrf.mxu3 }
 0x224   :  { %v198_v36 = vsel %vm79_vm0, %v191_v29, -inf }
 0x22a   :  { %v283_v30 = vpop.f32.mrf.mxu2 }
 0x22b   :  { %v193_v31 = vpop.f32.mrf.mxu3  ;;  %v310_v32 = vsel %vm79_vm0, %v283_v30, -inf }
 0x22c   :  { %311 = vmax.xlane.f32.xlu1 %v310_v32 }
 0x232   :  { %v285_v33 = vpop.f32.mrf.mxu2 }
 0x233   :  { %v2247_v34 = vpop.f32.mrf.mxu3 }
 0x234   :  { %v313_v51 = vsel %vm79_vm0, %v2247_v34, -inf }
 0x23b   :  { %v308_v35 = vpop.f32.mrf.mxu3 }
 0x245   :  { %334 = vrot.lane.b32.xlu1 %v2221_v11, %s2139_s28 }
 0x26f   :  { %199 = vmax.xlane.f32.xlu1 %v198_v36 }
 0x288   :  { %241 = vrot.lane.b32.xlu1 %v2227_v15, %s2140_s29 }
 0x28f   :  { %v197_v37 = vpop.xlane.xlu0 %196 }
 0x290   :  { %v201_v38 = vsub.f32 %v167_v26, %v197_v37  ;;  %442 = vrot.lane.b32.xlu1 %v2227_v15, %s2141_s30 }
 0x292   :  { %v203_v39 = vmul.f32 1.442695, %v201_v38 }
 0x294   :  { %1945 = vpow2.f32 %v203_v39 }
 0x298   :  { %489 = vrot.lane.b32.xlu1 %v2221_v11, %s2142_s9 }
 0x29a   :  { %v1946_v40 = vpop.eup %1945 }
 0x29b   :  { %v207_v41 = vsel %vm79_vm0, %v1946_v40, 0.0 }
 0x29c   :  { %208 = vadd.xlane.f32.xlu2 %v207_v41 }
 0x29f   :  { %v312_v42 = vpop.xlane.xlu1 %311 }
 0x2a0   :  { %v316_v43 = vsub.f32 %v283_v30, %v312_v42  ;;  %558 = vrot.lane.b32.xlu1 %v2221_v11, %s2143_s10 }
 0x2a2   :  { %v318_v44 = vmul.f32 1.442695, %v316_v43 }
 0x2a4   :  { %1947 = vpow2.f32 %v318_v44 }
 0x2a8   :  { %581 = vrot.lane.b32.xlu1 %v2227_v15, %s2143_s10 }
 0x2aa   :  { %v1948_v45 = vpop.eup %1947 }
 0x2ab   :  { %v322_v46 = vsel %vm79_vm0, %v1948_v45, 0.0 }
 0x2ac   :  { %323 = vadd.xlane.f32.xlu0 %v322_v46 }
 0x2b0   :  { %556 = vrot.lane.b32.xlu1 %v2221_v11, %s2144_s11 }
 0x2b4   :  { %219 = vrot.lane.b32.xlu2 %v2221_v11, %s2140_s29 }
 0x2b7   :  { %v335_v47 = vpop.permute.xlu1 %334 }
 0x2b8   :  { %579 = vrot.lane.b32.xlu1 %v2227_v15, %s2144_s11  ;;  %v340_v7 = vsel %vm224_vm2, %v335_v47, 0 }
 0x2bc   :  { %419 = vrot.lane.b32.xlu2 %v2221_v11, %s2141_s30 }
 0x2c0   :  { %510 = vrot.lane.b32.xlu1 %v2227_v15, %s2142_s9  ;;  %421 = vrot.lane.b32.xlu0 %v2221_v11, %s2145_s12 }
 0x2e2   :  { %v200_v48 = vpop.xlane.xlu1 %199 }
 0x2e3   :  { %v202_v49 = vsub.f32 %v191_v29, %v200_v48 }
 0x2e5   :  { %v205_v50 = vmul.f32 1.442695, %v202_v49 }
 0x2e7   :  { %1949 = vpow2.f32 %v205_v50 }
 0x2ea   :  { %314 = vmax.xlane.f32.xlu0 %v313_v51 }
 0x2ed   :  { %v1950_v54 = vpop.eup %1949 }
 0x2ee   :  { %v210_v55 = vsel %vm79_vm0, %v1950_v54, 0.0 }
 0x2ef   :  { %211 = vadd.xlane.f32.xlu2 %v210_v55 }
 0x2fa   :  { %v242_v56 = vpop.permute.xlu1 %241 }
 0x2fb   :  { %v247_v57 = vsel %vm224_vm2, %v242_v56, 0 }
 0x2fc   :  { %256 = vmatpush.bf16.msrb.mxu1 %v247_v57 }
 0x302   :  { %v2284_v58 = vpop.permute.xlu1 %442 }
 0x307   :  { %355 = vrot.lane.b32.xlu2 %v2227_v15, %s2139_s28 }
 0x30a   :  { %v490_v59 = vpop.permute.xlu1 %489 }
 0x30b   :  { %v495_v60 = vsel %vm224_vm2, %v490_v59, 0 }
 0x30c   :  { %504 = vmatpush.bf16.msrb.mxu2 %v495_v60 }
 0x30f   :  { %v209_v61 = vpop.xlane.xlu2 %208 }
 0x310   :  { %1951 = vrcp.f32 %v209_v61 }
 0x312   :  { %v2289_v62 = vpop.permute.xlu1 %558 }
 0x313   :  { %v564_v49 = vsel %vm79_vm0, %v2289_v62, 0 }
 0x316   :  { %v1952_v1 = vpop.eup %1951 }
 0x317   :  { %v215_v2 = vmul.f32 %v1952_v1, %v1946_v40  ;;  %v220_v3 = vpop.permute.xlu2 %219 }
 0x318   :  { %v226_v4 = vsel %vm224_vm2, %v220_v3, 0 }
 0x319   :  { %235 = vmatpush.bf16.msrb.mxu0 %v226_v4  ;;  %v217_v8 = vpack.c.bf16 %v215_v2, %v215_v2 }
 0x31a   :  { %v2297_v9 = vpop.permute.xlu1 %581 }
 0x31b   :  { %v587_v59 = vsel %vm79_vm0, %v2297_v9, 0 }
 0x31c   :  { %1784 = vmatmul.msk.bf16.vlgmr.msrb.gmra.mxu0 %vm79_vm0, %v217_v8 }
 0x31d   :  { %349 = vmatpush.bf16.msra.mxu0 %v340_v7 }
 0x31f   :  { %v324_v10 = vpop.xlane.xlu0 %323  ;;  %v420_v22 = vpop.permute.xlu2 %419 }
 0x320   :  { %1953 = vrcp.f32 %v324_v10 }
 0x322   :  { %v557_v12 = vpop.permute.xlu1 %556 }
 0x326   :  { %v1954_v13 = vpop.eup %1953 }
 0x327   :  { %v330_v14 = vmul.f32 %v1954_v13, %v1948_v45 }
 0x329   :  { %v332_v16 = vpack.c.bf16 %v330_v14, %v330_v14 }
 0x32a   :  { %v2300_v17 = vpop.permute.xlu1 %579 }
 0x32c   :  { %1788 = vmatmul.msk.bf16.vlgmr.msra.gmra.mxu0 %vm79_vm0, %v332_v16 }
 0x332   :  { %v422_v18 = vpop.permute.xlu0 %421  ;;  %v511_v19 = vpop.permute.xlu1 %510 }
 0x333   :  { %v427_v20 = vsel %vm79_vm0, %v422_v18, 0  ;;  %v516_v21 = vsel %vm224_vm2, %v511_v19, 0 }
 0x334   :  { %436 = vmatpush.bf16.xpose.msrb.mxu0 %v427_v20  ;;  %525 = vmatpush.bf16.msrb.mxu3 %v516_v21 }
 0x33c   :  { %1793 = vmatmul.msk.bf16.vlgmr.msrb.gmra.mxu0 %vm79_vm0, %v420_v22 }
 0x35d   :  { %v315_v23 = vpop.xlane.xlu0 %314 }
 0x35e   :  { %v317_v24 = vsub.f32 %v2247_v34, %v315_v23 }
 0x360   :  { %v320_v25 = vmul.f32 1.442695, %v317_v24 }
 0x362   :  { %1955 = vpow2.f32 %v320_v25  ;;  %v212_v26 = vpop.xlane.xlu2 %211 }
 0x363   :  { %1957 = vrcp.f32 %v212_v26 }
 0x368   :  { %v1956_v27 = vpop.eup %1955 }
 0x369   :  { %v1958_v28 = vpop.eup %1957  ;;  %v325_v29 = vsel %vm79_vm0, %v1956_v27, 0.0 }
 0x36a   :  { %v216_v30 = vmul.f32 %v1958_v28, %v1950_v54  ;;  %326 = vadd.xlane.f32.xlu0 %v325_v29  ;;  %v356_v31 = vpop.permute.xlu2 %355 }
 0x36b   :  { %v361_v32 = vsel %vm224_vm2, %v356_v31, 0 }
 0x36c   :  { %370 = vmatpush.bf16.msra.mxu1 %v361_v32  ;;  %v218_v33 = vpack.c.bf16 %v216_v30, %v216_v30 }
 0x36e   :  { %1785 = vmatmul.msk.bf16.vlgmr.msrb.gmra.mxu1 %vm79_vm0, %v218_v33 }
 0x37e   :  { %444 = vrot.lane.b32.xlu0 %v2227_v15, %s2145_s12 }
 0x399   :  { %v237_v34 = vpop.f32.mrf.mxu0 }
 0x3a1   :  { %v239_v35 = vpop.f32.mrf.mxu0 }
 0x3a9   :  { %v351_v36 = vpop.f32.mrf.mxu0 }
 0x3b1   :  { %v353_v37 = vpop.f32.mrf.mxu0 }
 0x3b9   :  { %v438_v38 = vpop.f32.mrf.mxu0 }
 0x3ba   :  { %v465_v39 = vsel %vm79_vm0, %v438_v38, -inf }
 0x3bb   :  { %466 = vmax.xlane.f32.xlu2 %v465_v39 }
 0x3c1   :  { %v440_v40 = vpop.f32.mrf.mxu0 }
 0x3dd   :  { %v327_v41 = vpop.xlane.xlu0 %326 }
 0x3de   :  { %1959 = vrcp.f32 %v327_v41  ;;  %v1797_v41 = vld [vmem:[%s2603_s3 + $0x8] sm:$0xf] }
 0x3e4   :  { %v1960_v42 = vpop.eup %1959 }
 0x3e5   :  { %v331_v43 = vmul.f32 %v1960_v42, %v1956_v27  ;;  %v538_v42 = vsel %vm224_vm2, %v1797_v41, 0 }
 0x3e6   :  { %547 = vmatpush.bf16.msra.mxu0 %v538_v42 }
 0x3e7   :  { %v333_v44 = vpack.c.bf16 %v331_v43, %v331_v43 }
 0x3e9   :  { %1789 = vmatmul.msk.bf16.vlgmr.msra.gmra.mxu1 %vm79_vm0, %v333_v44 }
 0x3eb   :  { %v258_v45 = vpop.f32.mrf.mxu1 }
 0x3ec   :  { %v262_v46 = vpack.c.bf16 %v258_v45, %v237_v34 }
 0x3ee   :  { %1792 = vmatmul.msk.bf16.vlgmr.msra.gmra.mxu3 %vm79_vm0, %v262_v46 }
 0x3f0   :  { %v445_v47 = vpop.permute.xlu0 %444 }
 0x3f1   :  { %v450_v48 = vsel %vm79_vm0, %v445_v47, 0 }
 0x3f2   :  { %459 = vmatpush.bf16.xpose.msrb.mxu1 %v450_v48 }
 0x3f3   :  { %v260_v50 = vpop.f32.mrf.mxu1 }
 0x3f9   :  { %1794 = vmatmul.msk.bf16.vlgmr.msrb.gmra.mxu1 %vm79_vm0, %v2284_v58 }
 0x3fa   :  { %573 = vmatpush.bf16.xpose.msra.mxu1 %v564_v49 }
 0x409   :  { %1799 = vmatmul.msk.bf16.vlgmr.msra.gmra.mxu1 %vm79_vm0, %v557_v12 }
 0x42e   :  { %v467_v51 = vpop.xlane.xlu2 %466 }
 0x42f   :  { %v471_v52 = vsub.f32 %v438_v38, %v467_v51 }
 0x431   :  { %v473_v53 = vmul.f32 1.442695, %v471_v52 }
 0x433   :  { %1961 = vpow2.f32 %v473_v53 }
 0x439   :  { %v1962_v54 = vpop.eup %1961 }
 0x43a   :  { %v477_v55 = vsel %vm79_vm0, %v1962_v54, 0.0 }
 0x43b   :  { %478 = vadd.xlane.f32.xlu0 %v477_v55 }
 0x466   :  { %v372_v56 = vpop.f32.mrf.mxu1 }
 0x467   :  { %v376_v57 = vpack.c.bf16 %v372_v56, %v351_v36 }
 0x469   :  { %1791 = vmatmul.msk.bf16.vlgmr.msra.gmra.mxu2 %vm79_vm0, %v376_v57 }
 0x46a   :  { %596 = vmatpush.bf16.xpose.msra.mxu2 %v587_v59  ;;  %v1803_v59 = vld [vmem:[%s2603_s3 + $0xc] sm:$0xf] }
 0x46e   :  { %v374_v60 = vpop.f32.mrf.mxu1 }
 0x46f   :  { %v675_v60 = vsel %vm224_vm2, %v1803_v59, 0 }
 0x470   :  { %684 = vmatpush.bf16.msrb.mxu1 %v675_v60 }
 0x471   :  { %v414_v43 = vpop.f32.mrf.mxu3 }
 0x476   :  { %v461_v58 = vpop.f32.mrf.mxu1 }
 0x477   :  { %v468_v61 = vsel %vm79_vm0, %v461_v58, -inf }
 0x478   :  { %469 = vmax.xlane.f32.xlu2 %v468_v61 }
 0x479   :  { %v416_v44 = vpop.f32.mrf.mxu3 }
 0x47e   :  { %v463_v62 = vpop.f32.mrf.mxu1 }
 0x486   :  { %v575_v63 = vpop.f32.mrf.mxu1 }
 0x487   :  { %v602_v0 = vsel %vm79_vm0, %v575_v63, -inf }
 0x488   :  { %603 = vmax.xlane.f32.xlu2 %v602_v0  ;;  %v2147_v0 = vmov 8.0  }
 0x48e   :  { %v577_v1 = vpop.f32.mrf.mxu1 }
 0x48f   :  { %v2358_v1 = vld [vmem:[%s2607_s7] sm:$0x3f] }
 0x4ae   :  { %v479_v2 = vpop.xlane.xlu0 %478 }
 0x4af   :  { %1963 = vrcp.f32 %v479_v2 }
 0x4b5   :  { %v1964_v3 = vpop.eup %1963 }
 0x4b6   :  { %v485_v4 = vmul.f32 %v1964_v3, %v1962_v54  ;;  %v693_v3 = vperm.slane %v2358_v1, 0 }
 0x4b8   :  { %v487_v7 = vpack.c.bf16 %v485_v4, %v485_v4 }
 0x4ba   :  { %1795 = vmatmul.msk.bf16.vlgmr.msrb.gmra.mxu2 %vm79_vm0, %v487_v7 }
 0x4ca   :  { %1800 = vmatmul.msk.bf16.vlgmr.msra.gmra.mxu2 %vm79_vm0, %v2300_v17 }
 0x4eb   :  { %v470_v8 = vpop.xlane.xlu2 %469 }
 0x4ec   :  { %v472_v9 = vsub.f32 %v461_v58, %v470_v8  ;;  %v394_v21 = vpop.f32.mrf.mxu2 }
 0x4ed   :  { %v415_v55 = vadd.f32 %v414_v43, %v394_v21 }
 0x4ee   :  { %v475_v10 = vmul.f32 1.442695, %v472_v9 }
 0x4f0   :  { %1965 = vpow2.f32 %v475_v10 }
 0x4f4   :  { %v2332_v22 = vpop.f32.mrf.mxu2 }
 0x4f5   :  { %v417_v10 = vadd.f32 %v416_v44, %v2332_v22 }
 0x4f6   :  { %v1966_v12 = vpop.eup %1965 }
 0x4f7   :  { %v480_v13 = vsel %vm79_vm0, %v1966_v12, 0.0 }
 0x4f8   :  { %481 = vadd.xlane.f32.xlu0 %v480_v13 }
 0x4fb   :  { %v604_v14 = vpop.xlane.xlu2 %603 }
 0x4fc   :  { %v608_v16 = vsub.f32 %v575_v63, %v604_v14 }
 0x4fe   :  { %v610_v18 = vmul.f32 1.442695, %v608_v16 }
 0x500   :  { %1967 = vpow2.f32 %v610_v18 }
 0x506   :  { %v1968_v19 = vpop.eup %1967 }
 0x507   :  { %v614_v20 = vsel %vm79_vm0, %v1968_v19, 0.0 }
 0x508   :  { %615 = vadd.xlane.f32.xlu1 %v614_v20 }
 0x53d   :  { %v506_v17 = vpop.f32.mrf.mxu2 }
 0x545   :  { %v508_v23 = vpop.f32.mrf.mxu2 }
 0x54d   :  { %v598_v24 = vpop.f32.mrf.mxu2 }
 0x54e   :  { %v605_v25 = vsel %vm79_vm0, %v598_v24, -inf }
 0x54f   :  { %606 = vmax.xlane.f32.xlu0 %v605_v25 }
 0x555   :  { %v600_v26 = vpop.f32.mrf.mxu2 }
 0x563   :  { %626 = vrot.lane.b32.xlu0 %v2221_v11, %s2146_s18 }
 0x56b   :  { %v482_v27 = vpop.xlane.xlu0 %481 }
 0x56c   :  { %1969 = vrcp.f32 %v482_v27 }
 0x572   :  { %v1970_v28 = vpop.eup %1969 }
 0x573   :  { %v486_v29 = vmul.f32 %v1970_v28, %v1966_v12 }
 0x575   :  { %v488_v30 = vpack.c.bf16 %v486_v29, %v486_v29 }
 0x577   :  { %1796 = vmatmul.msk.bf16.vlgmr.msrb.gmra.mxu3 %vm79_vm0, %v488_v30 }
 0x57b   :  { %v616_v34 = vpop.xlane.xlu1 %615 }
 0x5c2   :  { %v607_v31 = vpop.xlane.xlu0 %606 }
 0x5c3   :  { %v609_v32 = vsub.f32 %v598_v24, %v607_v31 }
 0x5c5   :  { %v612_v33 = vmul.f32 1.442695, %v609_v32 }
 0x5c7   :  { %1971 = vpow2.f32 %v612_v33 }
 0x5c8   :  { %1973 = vrcp.f32 %v616_v34 }
 0x5cd   :  { %v1972_v35 = vpop.eup %1971 }
 0x5ce   :  { %v617_v36 = vsel %vm79_vm0, %v1972_v35, 0.0  ;;  %v1974_v37 = vpop.eup %1973 }
 0x5cf   :  { %618 = vadd.xlane.f32.xlu2 %v617_v36  ;;  %v622_v38 = vmul.f32 %v1974_v37, %v1968_v19 }
 0x5d1   :  { %v624_v40 = vpack.c.bf16 %v622_v38, %v622_v38 }
 0x5d5   :  { %v627_v11 = vpop.permute.xlu0 %626 }
 0x5d6   :  { %v632_v39 = vsel %vm224_vm2, %v627_v11, 0 }
 0x5d7   :  { %641 = vmatpush.bf16.msra.mxu3 %v632_v39 }
 0x5da   :  { %1801 = vmatmul.msk.bf16.vlgmr.msra.gmra.mxu3 %vm79_vm0, %v624_v40 }
 0x5e7   :  { %647 = vrot.lane.b32.xlu2 %v2227_v15, %s2146_s18 }
 0x5fa   :  { %v527_v45 = vpop.f32.mrf.mxu3 }
 0x5fb   :  { %v531_v46 = vpack.c.bf16 %v527_v45, %v506_v17 }
 0x5fd   :  { %1798 = vmatmul.msk.bf16.vlgmr.msra.gmra.mxu0 %vm79_vm0, %v531_v46 }
 0x602   :  { %v529_v47 = vpop.f32.mrf.mxu3 }
 0x642   :  { %v619_v48 = vpop.xlane.xlu2 %618 }
 0x643   :  { %1975 = vrcp.f32 %v619_v48 }
 0x644   :  { %1977 = vrcp.f32 %v2147_v0 }
 0x649   :  { %v1976_v49 = vpop.eup %1975 }
 0x64a   :  { %v623_v50 = vmul.f32 %v1976_v49, %v1972_v35  ;;  %v648_v51 = vpop.permute.xlu2 %647  ;;  %v1978_v2 = vpop.eup %1977 }
 0x64b   :  { %v653_v52 = vsel %vm224_vm2, %v648_v51, 0  ;;  %v713_v8 = vmul.f32 8.0, %v1978_v2  ;;  %vm717_vm3 = vweird.f32 %v1978_v2 }
 0x64c   :  { %v625_v53 = vpack.c.bf16 %v623_v50, %v623_v50  ;;  %662 = vmatpush.bf16.msrb.mxu0 %v653_v52  ;;  %v1910_v50 = vld [vmem:[%s2604_s4 + $0x8] sm:$0xff] }
 0x64d   :  { %v714_v13 = vsub.f32 1.0, %v713_v8  ;;  %801 = vmatpush.bf16.msrb.mxu2 %v1910_v50 }
 0x64f   :  { %1802 = vmatmul.msk.bf16.vlgmr.msrb.gmra.mxu0 %vm79_vm0, %v625_v53  ;;  %v715_v20 = vmul.f32 %v1978_v2, %v714_v13 }
 0x651   :  { %v716_v25 = vadd.f32 %v1978_v2, %v715_v20 }
 0x653   :  { %v2366_v29 = vsel %vm717_vm3, %v1978_v2, %v716_v25  ;;  %v1913_v25 = vld [vmem:[%s2605_s5 + $0x10] sm:$0xff] }
 0x65d   :  { %v643_v54 = vpop.f32.mrf.mxu3 }
 0x665   :  { %v645_v15 = vpop.f32.mrf.mxu3 }
 0x666   :  { %v1909_v15 = vld [vmem:[%s2604_s4] sm:$0xff] }
 0x667   :  { %802 = vmatpush.bf16.msrb.mxu2 %v1909_v15 }
 0x67a   :  { %v549_v56 = vpop.f32.mrf.mxu0 }
 0x67b   :  { %v554_v57 = vadd.f32 %v549_v56, %v415_v55 }
 0x682   :  { %v551_v58 = vpop.f32.mrf.mxu0 }
 0x683   :  { %v555_v14 = vadd.f32 %v551_v58, %v417_v10 }
 0x6cc   :  { %v664_v61 = vpop.f32.mrf.mxu0 }
 0x6cd   :  { %v668_v62 = vpack.c.bf16 %v664_v61, %v643_v54 }
 0x6cf   :  { %1804 = vmatmul.msk.bf16.vlgmr.msrb.gmra.mxu1 %vm79_vm0, %v668_v62 }
 0x6d4   :  { %v666_v63 = vpop.f32.mrf.mxu0 }
 0x74c   :  { %v686_v4 = vpop.f32.mrf.mxu1 }
 0x74d   :  { %v691_v7 = vadd.f32 %v686_v4, %v554_v57 }
 0x74f   :  { %v694_v9 = vadd.f32 %v693_v3, %v691_v7 }
 0x751   :  { %v696_v12 = vadd.f32 %v694_v9, %v2214_v5 }
 0x753   :  { %v698_v16 = vsel %vm127_vm1, %v696_v12, 0.0 }
 0x754   :  { %v699_v18 = vrot.slane %v698_v16, 4  ;;  %v688_v19 = vpop.f32.mrf.mxu1 }
 0x755   :  { %v692_v21 = vadd.f32 %v688_v19, %v555_v14 }
 0x756   :  { %v700_v17 = vadd.f32 %v699_v18, %v698_v16  ;;  %v768_v18 = vperm.slane %v2358_v1, 2 }
 0x757   :  { %v695_v23 = vadd.f32 %v693_v3, %v692_v21 }
 0x758   :  { %v701_v24 = vrot.slane %v700_v17, 2 }
 0x759   :  { %v697_v26 = vadd.f32 %v695_v23, %v2216_v6 }
 0x75a   :  { %v702_v27 = vadd.f32 %v701_v24, %v700_v17  ;;  %v1914_v24 = vld [vmem:[%s2605_s5 + $0x18] sm:$0xff] }
 0x75b   :  { %v705_v22 = vsel %vm127_vm1, %v697_v26, 0.0  ;;  %853 = vmatpush.bf16.msrb.mxu3 %v1914_v24 }
 0x75c   :  { %v703_v28 = vrot.slane %v702_v27, 1  ;;  %v706_v5 = vrot.slane %v705_v22, 4 }
 0x75e   :  { %v704_v30 = vadd.f32 %v703_v28, %v702_v27  ;;  %v707_v31 = vadd.f32 %v706_v5, %v705_v22  ;;  %v1911_v27 = vld [vmem:[%s2605_s5] sm:$0xff]  ;;  %v1943_v28 = vld [vmem:[#allocation7] ss:$0 sm:$0xff] }
 0x75f   :  { %854 = vmatpush.bf16.msrb.mxu3 %v1913_v25 }
 0x760   :  { %v719_v32 = vmul.f32 %v2366_v29, %v704_v30  ;;  %v708_v33 = vrot.slane %v707_v31, 2 }
 0x762   :  { %v721_v34 = vsub.f32 %v696_v12, %v719_v32  ;;  %v709_v35 = vadd.f32 %v708_v33, %v707_v31  ;;  %v765_v12 = vperm.slane %v2358_v1, 1 }
 0x764   :  { %v723_v36 = vmul.f32 %v721_v34, %v721_v34  ;;  %v710_v37 = vrot.slane %v709_v35, 1 }
 0x766   :  { %v725_v38 = vsel %vm127_vm1, %v723_v36, 0.0  ;;  %v711_v6 = vadd.f32 %v710_v37, %v709_v35  ;;  %v820_v35 = vperm.slane %v2358_v1, 3 }
 0x767   :  { %v726_v11 = vrot.slane %v725_v38, 4 }
 0x768   :  { %v720_v39 = vmul.f32 %v2366_v29, %v711_v6 }
 0x769   :  { %v727_v40 = vadd.f32 %v726_v11, %v725_v38 }
 0x76a   :  { %v722_v41 = vsub.f32 %v697_v26, %v720_v39  ;;  %v1912_v26 = vld [vmem:[%s2605_s5 + $0x8] sm:$0xff] }
 0x76b   :  { %v728_v42 = vrot.slane %v727_v40, 2  ;;  %855 = vmatpush.bf16.msrb.mxu3 %v1912_v26 }
 0x76c   :  { %v724_v43 = vmul.f32 %v722_v41, %v722_v41 }
 0x76d   :  { %v729_v44 = vadd.f32 %v728_v42, %v727_v40 }
 0x76e   :  { %v732_v45 = vsel %vm127_vm1, %v724_v43, 0.0 }
 0x76f   :  { %v730_v46 = vrot.slane %v729_v44, 1  ;;  %v733_v47 = vrot.slane %v732_v45, 4  ;;  %856 = vmatpush.bf16.msrb.mxu3 %v1911_v27 }
 0x771   :  { %v731_v48 = vadd.f32 %v730_v46, %v729_v44  ;;  %v734_v49 = vadd.f32 %v733_v47, %v732_v45 }
 0x773   :  { %v739_v51 = vmul.f32 %v731_v48, %v2366_v29  ;;  %v735_v52 = vrot.slane %v734_v49, 2 }
 0x775   :  { %v741_v53 = vadd.f32 1e-05, %v739_v51  ;;  %v736_v54 = vadd.f32 %v735_v52, %v734_v49 }
 0x777   :  { %1979 = vrsqrt.f32 %v741_v53  ;;  %v737_v55 = vrot.slane %v736_v54, 1  ;;  %vm749_vm5 = vweird.f32 %v741_v53 }
 0x779   :  { %v738_v56 = vadd.f32 %v737_v55, %v736_v54 }
 0x77b   :  { %v740_v57 = vmul.f32 %v738_v56, %v2366_v29 }
 0x77d   :  { %v1980_v59 = vpop.eup %1979  ;;  %v742_v60 = vadd.f32 1e-05, %v740_v57 }
 0x77e   :  { %v744_v58 = vmul.f32 %v1980_v59, %v741_v53  ;;  %vm750_vm4 = vweird.f32 %v1980_v59 }
 0x77f   :  { %1981 = vrsqrt.f32 %v742_v60  ;;  %vm751_vm6 = vmor %vm749_vm5, %vm750_vm4  ;;  %vm759_vm8 = vweird.f32 %v742_v60 }
 0x780   :  { %v745_v61 = vmul.f32 %v1980_v59, %v744_v58 }
 0x782   :  { %v746_v62 = vmul.f32 0.5, %v745_v61 }
 0x784   :  { %v747_v63 = vsub.f32 1.5, %v746_v62 }
 0x785   :  { %v1982_v0 = vpop.eup %1981 }
 0x786   :  { %v748_v2 = vmul.f32 %v1980_v59, %v747_v63  ;;  %v754_v3 = vmul.f32 %v1982_v0, %v742_v60  ;;  %vm760_vm7 = vweird.f32 %v1982_v0 }
 0x787   :  { %vm761_vm9 = vmor %vm759_vm8, %vm760_vm7 }
 0x788   :  { %v755_v4 = vmul.f32 %v1982_v0, %v754_v3  ;;  %v752_v7 = vsel %vm751_vm6, %v1980_v59, %v748_v2 }
 0x789   :  { %v763_v10 = vmul.f32 %v752_v7, %v721_v34 }
 0x78a   :  { %v756_v8 = vmul.f32 0.5, %v755_v4 }
 0x78b   :  { %v766_v16 = vmul.f32 %v765_v12, %v763_v10 }
 0x78c   :  { %v757_v9 = vsub.f32 1.5, %v756_v8  ;;  %v1916_v8 = vld [vmem:[%s2602_s2 + $0x18] sm:$0xff] }
 0x78d   :  { %v769_v21 = vadd.f32 %v768_v18, %v766_v16  ;;  %960 = vmatpush.bf16.msra.mxu0 %v1916_v8 }
 0x78e   :  { %v758_v13 = vmul.f32 %v1982_v0, %v757_v9 }
 0x790   :  { %v762_v14 = vsel %vm761_vm9, %v1982_v0, %v758_v13 }
 0x791   :  { %v764_v19 = vmul.f32 %v762_v14, %v722_v41  ;;  %v1915_v14 = vld [vmem:[%s2602_s2 + $0x10] sm:$0xff] }
 0x792   :  { %961 = vmatpush.bf16.msra.mxu0 %v1915_v14 }
 0x793   :  { %v767_v20 = vmul.f32 %v765_v12, %v764_v19 }
 0x795   :  { %v770_v17 = vadd.f32 %v768_v18, %v767_v20 }
 0x797   :  { %v771_v23 = vpack.c.bf16 %v770_v17, %v769_v21 }
 0x799   :  { %1813 = vmatmul.msk.bf16.vlgmr.msrb.gmra.mxu2 %vm127_vm1, %v771_v23 }
 0x81c   :  { %v804_v22 = vpop.f32.mrf.mxu2 }
 0x81d   :  { %v805_v5 = vadd.f32 %v1943_v28, %v804_v22 }
 0x81f   :  { %v809_v32 = vmax.f32 %v805_v5, 0.0 }
 0x824   :  { %v806_v30 = vpop.f32.mrf.mxu2 }
 0x825   :  { %v807_v31 = vadd.f32 %v1943_v28, %v806_v30 }
 0x827   :  { %v810_v33 = vmax.f32 %v807_v31, 0.0 }
 0x829   :  { %v811_v34 = vpack.c.bf16 %v810_v33, %v809_v32  ;;  %v925_v33 = vperm.slane %v2358_v1, 4 }
 0x82b   :  { %1830 = vmatmul.msk.bf16.vlgmr.msrb.gmra.mxu3 %vm845_vm10, %v811_v34 }
 0x8ae   :  { %v858_v36 = vpop.f32.mrf.mxu3 }
 0x8af   :  { %v859_v37 = vadd.f32 %v858_v36, %v820_v35 }
 0x8b1   :  { %v863_v38 = vadd.f32 %v859_v37, %v769_v21  ;;  %v928_v37 = vperm.slane %v2358_v1, 5 }
 0x8b3   :  { %v865_v6 = vsel %vm127_vm1, %v863_v38, 0.0 }
 0x8b4   :  { %v866_v11 = vrot.slane %v865_v6, 4 }
 0x8b6   :  { %v867_v39 = vadd.f32 %v866_v11, %v865_v6  ;;  %v860_v40 = vpop.f32.mrf.mxu3 }
 0x8b7   :  { %v861_v41 = vadd.f32 %v860_v40, %v820_v35 }
 0x8b8   :  { %v868_v42 = vrot.slane %v867_v39, 2 }
 0x8b9   :  { %v864_v43 = vadd.f32 %v861_v41, %v770_v17 }
 0x8ba   :  { %v869_v44 = vadd.f32 %v868_v42, %v867_v39 }
 0x8bb   :  { %v872_v45 = vsel %vm127_vm1, %v864_v43, 0.0 }
 0x8bc   :  { %v870_v46 = vrot.slane %v869_v44, 1  ;;  %v873_v47 = vrot.slane %v872_v45, 4 }
 0x8be   :  { %v871_v48 = vadd.f32 %v870_v46, %v869_v44  ;;  %v874_v49 = vadd.f32 %v873_v47, %v872_v45 }
 0x8c0   :  { %v879_v50 = vmul.f32 %v871_v48, %v2366_v29  ;;  %v875_v51 = vrot.slane %v874_v49, 2 }
 0x8c2   :  { %v881_v52 = vsub.f32 %v863_v38, %v879_v50  ;;  %v876_v53 = vadd.f32 %v875_v51, %v874_v49 }
 0x8c4   :  { %v883_v54 = vmul.f32 %v881_v52, %v881_v52  ;;  %v877_v15 = vrot.slane %v876_v53, 1 }
 0x8c6   :  { %v885_v55 = vsel %vm127_vm1, %v883_v54, 0.0  ;;  %v878_v56 = vadd.f32 %v877_v15, %v876_v53 }
 0x8c7   :  { %v886_v57 = vrot.slane %v885_v55, 4 }
 0x8c8   :  { %v880_v59 = vmul.f32 %v878_v56, %v2366_v29 }
 0x8c9   :  { %v887_v60 = vadd.f32 %v886_v57, %v885_v55 }
 0x8ca   :  { %v882_v58 = vsub.f32 %v864_v43, %v880_v59 }
 0x8cb   :  { %v888_v61 = vrot.slane %v887_v60, 2 }
 0x8cc   :  { %v884_v62 = vmul.f32 %v882_v58, %v882_v58 }
 0x8cd   :  { %v889_v63 = vadd.f32 %v888_v61, %v887_v60 }
 0x8ce   :  { %v892_v0 = vsel %vm127_vm1, %v884_v62, 0.0 }
 0x8cf   :  { %v890_v2 = vrot.slane %v889_v63, 1  ;;  %v893_v3 = vrot.slane %v892_v0, 4 }
 0x8d1   :  { %v891_v4 = vadd.f32 %v890_v2, %v889_v63  ;;  %v894_v7 = vadd.f32 %v893_v3, %v892_v0 }
 0x8d3   :  { %v899_v9 = vmul.f32 %v891_v4, %v2366_v29  ;;  %v895_v10 = vrot.slane %v894_v7, 2 }
 0x8d5   :  { %v901_v12 = vadd.f32 1e-05, %v899_v9  ;;  %v896_v13 = vadd.f32 %v895_v10, %v894_v7 }
 0x8d7   :  { %1983 = vrsqrt.f32 %v901_v12  ;;  %v897_v16 = vrot.slane %v896_v13, 1  ;;  %vm909_vm12 = vweird.f32 %v901_v12 }
 0x8d9   :  { %v898_v18 = vadd.f32 %v897_v16, %v896_v13 }
 0x8db   :  { %v900_v19 = vmul.f32 %v898_v18, %v2366_v29 }
 0x8dd   :  { %v1984_v20 = vpop.eup %1983  ;;  %v902_v21 = vadd.f32 1e-05, %v900_v19 }
 0x8de   :  { %v904_v17 = vmul.f32 %v1984_v20, %v901_v12  ;;  %vm910_vm11 = vweird.f32 %v1984_v20 }
 0x8df   :  { %1985 = vrsqrt.f32 %v902_v21  ;;  %vm911_vm13 = vmor %vm909_vm12, %vm910_vm11  ;;  %vm919_vm15 = vweird.f32 %v902_v21 }
 0x8e0   :  { %v905_v23 = vmul.f32 %v1984_v20, %v904_v17 }
 0x8e2   :  { %v906_v24 = vmul.f32 0.5, %v905_v23 }
 0x8e4   :  { %v907_v25 = vsub.f32 1.5, %v906_v24 }
 0x8e5   :  { %v1986_v26 = vpop.eup %1985 }
 0x8e6   :  { %v908_v27 = vmul.f32 %v1984_v20, %v907_v25  ;;  %v914_v22 = vmul.f32 %v1986_v26, %v902_v21  ;;  %vm920_vm14 = vweird.f32 %v1986_v26 }
 0x8e7   :  { %vm921_vm3 = vmor %vm919_vm15, %vm920_vm14 }
 0x8e8   :  { %v915_v28 = vmul.f32 %v1986_v26, %v914_v22  ;;  %v912_v5 = vsel %vm911_vm13, %v1984_v20, %v908_v27 }
 0x8e9   :  { %v923_v32 = vmul.f32 %v912_v5, %v881_v52 }
 0x8ea   :  { %v916_v30 = vmul.f32 0.5, %v915_v28 }
 0x8eb   :  { %v926_v36 = vmul.f32 %v925_v33, %v923_v32 }
 0x8ec   :  { %v917_v31 = vsub.f32 1.5, %v916_v30 }
 0x8ed   :  { %v2413_v11 = vadd.f32 %v928_v37, %v926_v36 }
 0x8ee   :  { %v918_v34 = vmul.f32 %v1986_v26, %v917_v31 }
 0x8f0   :  { %v922_v35 = vsel %vm921_vm3, %v1986_v26, %v918_v34 }
 0x8f1   :  { %v924_v38 = vmul.f32 %v922_v35, %v882_v58 }
 0x8f3   :  { %v927_v6 = vmul.f32 %v925_v33, %v924_v38 }
 0x8f5   :  { %v2415_v39 = vadd.f32 %v928_v37, %v927_v6 }
 0x8f7   :  { %v933_v40 = vpack.c.bf16 %v2415_v39, %v2413_v11 }
 0x8f9   :  { %1844 = vmatmul.msk.bf16.vlgmr.msra.gmra.mxu0 %vm127_vm1, %v933_v40 }
 0x976   :  { %v963_v41 = vpop.f32.mrf.mxu0 }
 0x977   :  { %v968_v42 = vpack.c.bf16 %v963_v41, %v963_v41 }
 0x979   :  { %v971_v43 = vunpack.c.l.b16 %v968_v42 }
 0x97b   :  { %v2420_v44 = vpack.c.b16 %v971_v43, %v971_v43  ;;  %v1854_v43 = vld [vmem:[%s2603_s3 + $0x14] sm:$0xf] }
 0x97d   :  { %1087 = vrot.lane.b32.xlu2 %v2420_v44, %s2136_s25  ;;  %973 = vrot.lane.b32.xlu0 %v2420_v44, %s2137_s26 }
 0x97e   :  { %v965_v1 = vpop.f32.mrf.mxu0 }
 0x97f   :  { %v969_v45 = vpack.c.bf16 %v965_v1, %v965_v1  ;;  %v1206_v1 = vsel %vm224_vm2, %v1854_v43, 0 }
 0x981   :  { %v995_v46 = vunpack.c.l.b16 %v969_v45 }
 0x983   :  { %v2426_v47 = vpack.c.b16 %v995_v46, %v995_v46 }
 0x985   :  { %1089 = vrot.lane.b32.xlu0 %v2420_v44, %s2138_s27  ;;  %1110 = vrot.lane.b32.xlu2 %v2426_v47, %s2136_s25 }
 0x986   :  { %997 = vrot.lane.b32.xlu1 %v2426_v47, %s2137_s26 }
 0x98d   :  { %1112 = vrot.lane.b32.xlu0 %v2426_v47, %s2138_s27 }
 0x9d7   :  { %v1088_v55 = vpop.permute.xlu2 %1087 }
 0x9df   :  { %v1111_v56 = vpop.permute.xlu2 %1110 }
 0x9ef   :  { %v974_v48 = vpop.permute.xlu0 %973 }
 0x9f0   :  { %v979_v49 = vsel %vm79_vm0, %v974_v48, 0 }
 0x9f1   :  { %988 = vmatpush.bf16.xpose.msra.mxu1 %v979_v49 }
 0x9f7   :  { %v1090_v50 = vpop.permute.xlu0 %1089 }
 0x9f8   :  { %v1095_v51 = vsel %vm79_vm0, %v1090_v50, 0  ;;  %v998_v52 = vpop.permute.xlu1 %997  ;;  %1845 = vmatmul.msk.bf16.vlgmr.msra.gmra.mxu1 %vm79_vm0, %v968_v42 }
 0x9f9   :  { %v1003_v53 = vsel %vm79_vm0, %v998_v52, 0  ;;  %1104 = vmatpush.bf16.xpose.msrb.mxu1 %v1095_v51 }
 0x9fa   :  { %1012 = vmatpush.bf16.xpose.msra.mxu2 %v1003_v53 }
 0x9ff   :  { %v1113_v54 = vpop.permute.xlu0 %1112 }
 0xa00   :  { %v1118_v15 = vsel %vm79_vm0, %v1113_v54, 0 }
 0xa01   :  { %1846 = vmatmul.msk.bf16.vlgmr.msra.gmra.mxu2 %vm79_vm0, %v969_v45  ;;  %1215 = vmatpush.bf16.msra.mxu1 %v1206_v1 }
 0xa02   :  { %1127 = vmatpush.bf16.xpose.msrb.mxu2 %v1118_v15 }
 0xa08   :  { %1850 = vmatmul.msk.bf16.vlgmr.msrb.gmra.mxu1 %vm79_vm0, %v1088_v55 }
 0xa11   :  { %1851 = vmatmul.msk.bf16.vlgmr.msrb.gmra.mxu2 %vm79_vm0, %v1111_v56 }
 0xa75   :  { %v990_v57 = vpop.f32.mrf.mxu1 }
 0xa76   :  { %v1018_v59 = vsel %vm79_vm0, %v990_v57, -inf }
 0xa77   :  { %1019 = vmax.xlane.f32.xlu0 %v1018_v59 }
 0xa7d   :  { %v992_v60 = vpop.f32.mrf.mxu1 }
 0xa84   :  { %v1014_v58 = vpop.f32.mrf.mxu2 }
 0xa85   :  { %v1106_v61 = vpop.f32.mrf.mxu1  ;;  %v1021_v4 = vsel %vm79_vm0, %v1014_v58, -inf }
 0xa86   :  { %v1133_v62 = vsel %vm79_vm0, %v1106_v61, -inf }
 0xa87   :  { %1134 = vmax.xlane.f32.xlu2 %v1133_v62 }
 0xa8b   :  { %1042 = vrot.lane.b32.xlu0 %v2420_v44, %s2140_s29 }
 0xa8c   :  { %v1016_v63 = vpop.f32.mrf.mxu2 }
 0xa8d   :  { %v1108_v0 = vpop.f32.mrf.mxu1 }
 0xa93   :  { %1242 = vrot.lane.b32.xlu0 %v2420_v44, %s2141_s30 }
 0xa94   :  { %v2450_v2 = vpop.f32.mrf.mxu2 }
 0xa95   :  { %v1136_v5 = vsel %vm79_vm0, %v2450_v2, -inf }
 0xa9c   :  { %v1131_v3 = vpop.f32.mrf.mxu2 }
 0xabd   :  { %1022 = vmax.xlane.f32.xlu0 %v1021_v4 }
 0xad1   :  { %1063 = vrot.lane.b32.xlu0 %v2426_v47, %s2140_s29 }
 0xad9   :  { %1265 = vrot.lane.b32.xlu0 %v2426_v47, %s2141_s30 }
 0xaea   :  { %v1020_v7 = vpop.xlane.xlu0 %1019 }
 0xaeb   :  { %v1024_v8 = vsub.f32 %v990_v57, %v1020_v7  ;;  %v1849_v57 = vld [vmem:[%s2603_s3 + $0x10] sm:$0xf] }
 0xaec   :  { %v1226_v59 = vsel %vm224_vm2, %v1849_v57, 0 }
 0xaed   :  { %v1026_v9 = vmul.f32 1.442695, %v1024_v8  ;;  %1235 = vmatpush.bf16.msra.mxu2 %v1226_v59 }
 0xaef   :  { %1987 = vpow2.f32 %v1026_v9 }
 0xaf5   :  { %v1988_v10 = vpop.eup %1987 }
 0xaf6   :  { %v1030_v12 = vsel %vm79_vm0, %v1988_v10, 0.0 }
 0xaf7   :  { %1031 = vadd.xlane.f32.xlu1 %v1030_v12 }
 0xafa   :  { %v1135_v13 = vpop.xlane.xlu2 %1134 }
 0xafb   :  { %v1139_v14 = vsub.f32 %v1106_v61, %v1135_v13 }
 0xafd   :  { %v1141_v16 = vmul.f32 1.442695, %v1139_v14  ;;  %v1043_v18 = vpop.permute.xlu0 %1042 }
 0xafe   :  { %v1048_v19 = vsel %vm224_vm2, %v1043_v18, 0 }
 0xaff   :  { %1989 = vpow2.f32 %v1141_v16  ;;  %1057 = vmatpush.bf16.msra.mxu3 %v1048_v19 }
 0xb05   :  { %v1990_v20 = vpop.eup %1989  ;;  %v1243_v17 = vpop.permute.xlu0 %1242 }
 0xb06   :  { %v1145_v21 = vsel %vm79_vm0, %v1990_v20, 0.0 }
 0xb07   :  { %1146 = vadd.xlane.f32.xlu2 %v1145_v21 }
 0xb10   :  { %1244 = vrot.lane.b32.xlu1 %v2420_v44, %s2145_s12 }
 0xb1f   :  { %1157 = vrot.lane.b32.xlu2 %v2420_v44, %s2139_s28 }
 0xb30   :  { %v1023_v23 = vpop.xlane.xlu0 %1022 }
 0xb31   :  { %v1025_v24 = vsub.f32 %v1014_v58, %v1023_v23 }
 0xb33   :  { %v1028_v25 = vmul.f32 1.442695, %v1025_v24 }
 0xb35   :  { %1991 = vpow2.f32 %v1028_v25 }
 0xb3b   :  { %v1992_v26 = vpop.eup %1991 }
 0xb3c   :  { %v1033_v27 = vsel %vm79_vm0, %v1992_v26, 0.0 }
 0xb3d   :  { %1034 = vadd.xlane.f32.xlu1 %v1033_v27 }
 0xb43   :  { %v1064_v22 = vpop.permute.xlu0 %1063 }
 0xb44   :  { %v1069_v28 = vsel %vm224_vm2, %v1064_v22, 0 }
 0xb45   :  { %1078 = vmatpush.bf16.msrb.mxu0 %v1069_v28 }
 0xb48   :  { %1137 = vmax.xlane.f32.xlu2 %v1136_v5 }
 0xb4b   :  { %v1266_v24 = vpop.permute.xlu0 %1265 }
 0xb56   :  { %1267 = vrot.lane.b32.xlu1 %v2426_v47, %s2145_s12 }
 0xb5e   :  { %1312 = vrot.lane.b32.xlu1 %v2420_v44, %s2142_s9 }
 0xb66   :  { %1381 = vrot.lane.b32.xlu1 %v2420_v44, %s2143_s10 }
 0xb6a   :  { %v1032_v30 = vpop.xlane.xlu1 %1031 }
 0xb6b   :  { %1993 = vrcp.f32 %v1032_v30 }
 0xb6e   :  { %1404 = vrot.lane.b32.xlu1 %v2426_v47, %s2143_s10 }
 0xb71   :  { %v1994_v31 = vpop.eup %1993 }
 0xb72   :  { %v1038_v32 = vmul.f32 %v1994_v31, %v1988_v10 }
 0xb74   :  { %v1040_v33 = vpack.c.bf16 %v1038_v32, %v1038_v32 }
 0xb76   :  { %1379 = vrot.lane.b32.xlu1 %v2420_v44, %s2144_s11  ;;  %1847 = vmatmul.msk.bf16.vlgmr.msra.gmra.mxu3 %vm79_vm0, %v1040_v33 }
 0xb7a   :  { %v1147_v34 = vpop.xlane.xlu2 %1146 }
 0xb7b   :  { %1995 = vrcp.f32 %v1147_v34 }
 0xb7e   :  { %1402 = vrot.lane.b32.xlu1 %v2426_v47, %s2144_s11 }
 0xb81   :  { %v1996_v35 = vpop.eup %1995 }
 0xb82   :  { %v1153_v36 = vmul.f32 %v1996_v35, %v1990_v20  ;;  %v1158_v37 = vpop.permute.xlu2 %1157  ;;  %v1245_v38 = vpop.permute.xlu1 %1244 }
 0xb83   :  { %v1163_v6 = vsel %vm224_vm2, %v1158_v37, 0  ;;  %v1250_v40 = vsel %vm79_vm0, %v1245_v38, 0 }
 0xb84   :  { %v1155_v41 = vpack.c.bf16 %v1153_v36, %v1153_v36  ;;  %1172 = vmatpush.bf16.msrb.mxu3 %v1163_v6 }
 0xb86   :  { %1333 = vrot.lane.b32.xlu1 %v2426_v47, %s2142_s9 }
 0xb87   :  { %1852 = vmatmul.msk.bf16.vlgmr.msrb.gmra.mxu3 %vm79_vm0, %v1155_v41 }
 0xb88   :  { %1259 = vmatpush.bf16.xpose.msra.mxu3 %v1250_v40 }
 0xb97   :  { %1857 = vmatmul.msk.bf16.vlgmr.msra.gmra.mxu3 %vm79_vm0, %v1243_v17 }
 0xbb0   :  { %v1035_v42 = vpop.xlane.xlu1 %1034 }
 0xbb1   :  { %1997 = vrcp.f32 %v1035_v42 }
 0xbb7   :  { %v1998_v45 = vpop.eup %1997 }
 0xbb8   :  { %v1039_v46 = vmul.f32 %v1998_v45, %v1992_v26 }
 0xbba   :  { %v1041_v48 = vpack.c.bf16 %v1039_v46, %v1039_v46 }
 0xbbb   :  { %v1138_v49 = vpop.xlane.xlu2 %1137 }
 0xbbc   :  { %v1140_v50 = vsub.f32 %v2450_v2, %v1138_v49  ;;  %1848 = vmatmul.msk.bf16.vlgmr.msrb.gmra.mxu0 %vm79_vm0, %v1041_v48 }
 0xbbe   :  { %v1143_v51 = vmul.f32 1.442695, %v1140_v50 }
 0xbc0   :  { %1999 = vpow2.f32 %v1143_v51 }
 0xbc6   :  { %v2000_v52 = vpop.eup %1999 }
 0xbc7   :  { %v1148_v53 = vsel %vm79_vm0, %v2000_v52, 0.0 }
 0xbc8   :  { %1149 = vadd.xlane.f32.xlu2 %v1148_v53  ;;  %v1268_v54 = vpop.permute.xlu1 %1267 }
 0xbc9   :  { %v1273_v21 = vsel %vm79_vm0, %v1268_v54, 0 }
 0xbd0   :  { %v1313_v15 = vpop.permute.xlu1 %1312 }
 0xbd1   :  { %v1318_v55 = vsel %vm224_vm2, %v1313_v15, 0 }
 0xbd2   :  { %1327 = vmatpush.bf16.msrb.mxu1 %v1318_v55 }
 0xbd8   :  { %v1382_v56 = vpop.permute.xlu1 %1381 }
 0xbd9   :  { %v1387_v23 = vsel %vm79_vm0, %v1382_v56, 0 }
 0xbe0   :  { %1178 = vrot.lane.b32.xlu2 %v2426_v47, %s2139_s28  ;;  %v1405_v60 = vpop.permute.xlu1 %1404 }
 0xbe1   :  { %v1410_v31 = vsel %vm79_vm0, %v1405_v60, 0 }
 0xbe8   :  { %v1380_v58 = vpop.permute.xlu1 %1379 }
 0xbf0   :  { %v1403_v61 = vpop.permute.xlu1 %1402 }
 0xbf8   :  { %v1334_v62 = vpop.permute.xlu1 %1333 }
 0xbf9   :  { %v1339_v63 = vsel %vm224_vm2, %v1334_v62, 0  ;;  %v1059_v0 = vpop.f32.mrf.mxu3 }
 0xbfa   :  { %1348 = vmatpush.bf16.msrb.mxu2 %v1339_v63 }
 0xc01   :  { %v1061_v2 = vpop.f32.mrf.mxu3 }
 0xc0a   :  { %v1174_v3 = vpop.f32.mrf.mxu3 }
 0xc12   :  { %v1176_v4 = vpop.f32.mrf.mxu3 }
 0xc1a   :  { %v1261_v7 = vpop.f32.mrf.mxu3 }
 0xc1b   :  { %v1288_v8 = vsel %vm79_vm0, %v1261_v7, -inf }
 0xc1c   :  { %1289 = vmax.xlane.f32.xlu0 %v1288_v8 }
 0xc22   :  { %v1263_v9 = vpop.f32.mrf.mxu3 }
 0xc39   :  { %v1080_v10 = vpop.f32.mrf.mxu0 }
 0xc3a   :  { %v1084_v12 = vpack.c.bf16 %v1080_v10, %v1059_v0 }
 0xc3b   :  { %v1150_v13 = vpop.xlane.xlu2 %1149 }
 0xc3c   :  { %2001 = vrcp.f32 %v1150_v13  ;;  %1856 = vmatmul.msk.bf16.vlgmr.msra.gmra.mxu2 %vm79_vm0, %v1084_v12 }
 0xc41   :  { %v1082_v14 = vpop.f32.mrf.mxu0 }
 0xc42   :  { %v2002_v16 = vpop.eup %2001  ;;  %v1861_v14 = vld [vmem:[%s2603_s3 + $0x18] sm:$0xf] }
 0xc43   :  { %v1154_v18 = vmul.f32 %v2002_v16, %v2000_v52  ;;  %v1179_v19 = vpop.permute.xlu2 %1178  ;;  %v1361_v16 = vsel %vm224_vm2, %v1861_v14, 0 }
 0xc44   :  { %v1184_v20 = vsel %vm224_vm2, %v1179_v19, 0  ;;  %1370 = vmatpush.bf16.msrb.mxu3 %v1361_v16 }
 0xc45   :  { %v1156_v17 = vpack.c.bf16 %v1154_v18, %v1154_v18  ;;  %1193 = vmatpush.bf16.msra.mxu0 %v1184_v20 }
 0xc48   :  { %1853 = vmatmul.msk.bf16.vlgmr.msra.gmra.mxu0 %vm79_vm0, %v1156_v17 }
 0xc49   :  { %1282 = vmatpush.bf16.xpose.msrb.mxu0 %v1273_v21 }
 0xc51   :  { %1396 = vmatpush.bf16.xpose.msra.mxu0 %v1387_v23 }
 0xc58   :  { %1858 = vmatmul.msk.bf16.vlgmr.msrb.gmra.mxu0 %vm79_vm0, %v1266_v24 }
 0xc68   :  { %1863 = vmatmul.msk.bf16.vlgmr.msra.gmra.mxu0 %vm79_vm0, %v1380_v58 }
 0xc8f   :  { %v1290_v25 = vpop.xlane.xlu0 %1289 }
 0xc90   :  { %v1294_v26 = vsub.f32 %v1261_v7, %v1290_v25 }
 0xc92   :  { %v1296_v27 = vmul.f32 1.442695, %v1294_v26 }
 0xc94   :  { %2003 = vpow2.f32 %v1296_v27 }
 0xc9a   :  { %v2004_v22 = vpop.eup %2003 }
 0xc9b   :  { %v1300_v28 = vsel %vm79_vm0, %v2004_v22, 0.0 }
 0xc9c   :  { %1301 = vadd.xlane.f32.xlu2 %v1300_v28 }
 0xcbf   :  { %v1237_v18 = vpop.f32.mrf.mxu2 }
 0xcc5   :  { %v1195_v5 = vpop.f32.mrf.mxu0 }
 0xcc6   :  { %v1199_v30 = vpack.c.bf16 %v1195_v5, %v1174_v3 }
 0xcc7   :  { %v1239_v19 = vpop.f32.mrf.mxu2 }
 0xcc8   :  { %1855 = vmatmul.msk.bf16.vlgmr.msra.gmra.mxu1 %vm79_vm0, %v1199_v30 }
 0xcc9   :  { %1419 = vmatpush.bf16.xpose.msra.mxu1 %v1410_v31 }
 0xccd   :  { %v1197_v32 = vpop.f32.mrf.mxu0 }
 0xcce   :  { %v1867_v32 = vld [vmem:[%s2603_s3 + $0x1c] sm:$0xf] }
 0xcd5   :  { %v1284_v33 = vpop.f32.mrf.mxu0 }
 0xcd6   :  { %v1291_v34 = vsel %vm79_vm0, %v1284_v33, -inf }
 0xcd7   :  { %1292 = vmax.xlane.f32.xlu0 %v1291_v34 }
 0xcdd   :  { %v1286_v35 = vpop.f32.mrf.mxu0 }
 0xce5   :  { %v1398_v36 = vpop.f32.mrf.mxu0 }
 0xce6   :  { %v1425_v37 = vsel %vm79_vm0, %v1398_v36, -inf }
 0xce7   :  { %1426 = vmax.xlane.f32.xlu0 %v1425_v37 }
 0xced   :  { %v1400_v38 = vpop.f32.mrf.mxu0 }
 0xcee   :  { %v2545_v38 = vld [vmem:[%s2607_s7 + $0x8] sm:$0x3f] }
 0xd0f   :  { %v1302_v6 = vpop.xlane.xlu2 %1301 }
 0xd10   :  { %2005 = vrcp.f32 %v1302_v6  ;;  %v1516_v6 = vperm.slane %v2545_v38, 0 }
 0xd16   :  { %v2006_v40 = vpop.eup %2005 }
 0xd17   :  { %v1308_v41 = vmul.f32 %v2006_v40, %v2004_v22 }
 0xd19   :  { %v1310_v42 = vpack.c.bf16 %v1308_v41, %v1308_v41 }
 0xd1b   :  { %1859 = vmatmul.msk.bf16.vlgmr.msrb.gmra.mxu1 %vm79_vm0, %v1310_v42 }
 0xd2b   :  { %1864 = vmatmul.msk.bf16.vlgmr.msra.gmra.mxu1 %vm79_vm0, %v1403_v61 }
 0xd45   :  { %v1217_v54 = vpop.f32.mrf.mxu1 }
 0xd4a   :  { %v1293_v43 = vpop.xlane.xlu0 %1292 }
 0xd4b   :  { %v1295_v1 = vsub.f32 %v1284_v33, %v1293_v43  ;;  %v1498_v33 = vsel %vm224_vm2, %v1867_v32, 0 }
 0xd4c   :  { %1507 = vmatpush.bf16.msrb.mxu0 %v1498_v33 }
 0xd4d   :  { %v1298_v45 = vmul.f32 1.442695, %v1295_v1  ;;  %v2519_v15 = vpop.f32.mrf.mxu1 }
 0xd4e   :  { %v1240_v43 = vadd.f32 %v1239_v19, %v2519_v15  ;;  %v1918_v19 = vld [vmem:[%s2604_s4 + $0x18] sm:$0xff] }
 0xd4f   :  { %2007 = vpow2.f32 %v1298_v45  ;;  %1619 = vmatpush.bf16.msrb.mxu1 %v1918_v19 }
 0xd55   :  { %v2008_v46 = vpop.eup %2007 }
 0xd56   :  { %v1303_v48 = vsel %vm79_vm0, %v2008_v46, 0.0 }
 0xd57   :  { %1304 = vadd.xlane.f32.xlu2 %v1303_v48 }
 0xd5a   :  { %v1427_v49 = vpop.xlane.xlu0 %1426 }
 0xd5b   :  { %v1431_v50 = vsub.f32 %v1398_v36, %v1427_v49 }
 0xd5d   :  { %v1433_v51 = vmul.f32 1.442695, %v1431_v50 }
 0xd5f   :  { %2009 = vpow2.f32 %v1433_v51 }
 0xd65   :  { %v2010_v52 = vpop.eup %2009 }
 0xd66   :  { %v1437_v53 = vsel %vm79_vm0, %v2010_v52, 0.0 }
 0xd67   :  { %1438 = vadd.xlane.f32.xlu1 %v1437_v53 }
 0xd98   :  { %v1329_v55 = vpop.f32.mrf.mxu1 }
 0xda0   :  { %v1331_v56 = vpop.f32.mrf.mxu1 }
 0xda8   :  { %v1421_v57 = vpop.f32.mrf.mxu1 }
 0xda9   :  { %v1428_v59 = vsel %vm79_vm0, %v1421_v57, -inf }
 0xdaa   :  { %1429 = vmax.xlane.f32.xlu2 %v1428_v59 }
 0xdb0   :  { %v1423_v60 = vpop.f32.mrf.mxu1 }
 0xdc2   :  { %1449 = vrot.lane.b32.xlu2 %v2420_v44, %s2146_s18 }
 0xdca   :  { %v1305_v58 = vpop.xlane.xlu2 %1304 }
 0xdcb   :  { %2011 = vrcp.f32 %v1305_v58 }
 0xdd1   :  { %v2012_v61 = vpop.eup %2011 }
 0xdd2   :  { %v1309_v62 = vmul.f32 %v2012_v61, %v2008_v46 }
 0xdd4   :  { %v1311_v63 = vpack.c.bf16 %v1309_v62, %v1309_v62 }
 0xdd6   :  { %1860 = vmatmul.msk.bf16.vlgmr.msrb.gmra.mxu2 %vm79_vm0, %v1311_v63 }
 0xdda   :  { %v1439_v0 = vpop.xlane.xlu1 %1438 }
 0xddb   :  { %2013 = vrcp.f32 %v1439_v0 }
 0xde1   :  { %v2014_v7 = vpop.eup %2013 }
 0xde2   :  { %v1445_v8 = vmul.f32 %v2014_v7, %v2010_v52 }
 0xde4   :  { %v1447_v12 = vpack.c.bf16 %v1445_v8, %v1445_v8 }
 0xe1d   :  { %v1430_v2 = vpop.xlane.xlu2 %1429 }
 0xe1e   :  { %v1432_v3 = vsub.f32 %v1421_v57, %v1430_v2 }
 0xe20   :  { %v1435_v4 = vmul.f32 1.442695, %v1432_v3 }
 0xe22   :  { %2015 = vpow2.f32 %v1435_v4 }
 0xe25   :  { %v1450_v9 = vpop.permute.xlu2 %1449 }
 0xe26   :  { %v1455_v10 = vsel %vm224_vm2, %v1450_v9, 0 }
 0xe27   :  { %1464 = vmatpush.bf16.msra.mxu2 %v1455_v10 }
 0xe28   :  { %v2016_v44 = vpop.eup %2015 }
 0xe29   :  { %v1440_v13 = vsel %vm79_vm0, %v2016_v44, 0.0 }
 0xe2a   :  { %1441 = vadd.xlane.f32.xlu0 %v1440_v13  ;;  %1865 = vmatmul.msk.bf16.vlgmr.msra.gmra.mxu2 %vm79_vm0, %v1447_v12 }
 0xe3e   :  { %1470 = vrot.lane.b32.xlu0 %v2426_v47, %s2146_s18  ;;  %v1238_v47 = vadd.f32 %v1237_v18, %v1217_v54 }
 0xe59   :  { %v1350_v20 = vpop.f32.mrf.mxu2 }
 0xe5a   :  { %v1354_v21 = vpack.c.bf16 %v1350_v20, %v1329_v55 }
 0xe5c   :  { %1862 = vmatmul.msk.bf16.vlgmr.msrb.gmra.mxu3 %vm79_vm0, %v1354_v21 }
 0xe61   :  { %v1352_v17 = vpop.f32.mrf.mxu2 }
 0xe9d   :  { %v1442_v23 = vpop.xlane.xlu0 %1441 }
 0xe9e   :  { %2017 = vrcp.f32 %v1442_v23 }
 0xea4   :  { %v2018_v24 = vpop.eup %2017 }
 0xea5   :  { %v1446_v26 = vmul.f32 %v2018_v24, %v2016_v44  ;;  %v1917_v24 = vld [vmem:[%s2604_s4 + $0x10] sm:$0xff] }
 0xea6   :  { %1620 = vmatpush.bf16.msrb.mxu1 %v1917_v24 }
 0xea7   :  { %v1448_v28 = vpack.c.bf16 %v1446_v26, %v1446_v26 }
 0xead   :  { %v1466_v25 = vpop.f32.mrf.mxu2 }
 0xeb0   :  { %v1471_v27 = vpop.permute.xlu0 %1470 }
 0xeb1   :  { %v1476_v22 = vsel %vm224_vm2, %v1471_v27, 0 }
 0xeb2   :  { %1485 = vmatpush.bf16.msra.mxu3 %v1476_v22 }
 0xeb5   :  { %v1468_v5 = vpop.f32.mrf.mxu2  ;;  %1866 = vmatmul.msk.bf16.vlgmr.msra.gmra.mxu3 %vm79_vm0, %v1448_v28 }
 0xedf   :  { %v1372_v30 = vpop.f32.mrf.mxu3 }
 0xee0   :  { %v1377_v31 = vadd.f32 %v1372_v30, %v1238_v47 }
 0xee7   :  { %v1374_v34 = vpop.f32.mrf.mxu3 }
 0xee8   :  { %v1378_v45 = vadd.f32 %v1374_v34, %v1240_v43 }
 0xf38   :  { %v1487_v35 = vpop.f32.mrf.mxu3 }
 0xf39   :  { %v1491_v36 = vpack.c.bf16 %v1487_v35, %v1466_v25 }
 0xf3b   :  { %1868 = vmatmul.msk.bf16.vlgmr.msrb.gmra.mxu0 %vm79_vm0, %v1491_v36 }
 0xf40   :  { %v1489_v37 = vpop.f32.mrf.mxu3 }
 0xfb8   :  { %v1509_v40 = vpop.f32.mrf.mxu0 }
 0xfb9   :  { %v1514_v41 = vadd.f32 %v1509_v40, %v1377_v31 }
 0xfbb   :  { %v1517_v42 = vadd.f32 %v1516_v6, %v1514_v41  ;;  %v1581_v41 = vperm.slane %v2545_v38, 1 }
 0xfbd   :  { %v1519_v1 = vadd.f32 %v1517_v42, %v2413_v11 }
 0xfbf   :  { %v1521_v46 = vsel %vm127_vm1, %v1519_v1, 0.0 }
 0xfc0   :  { %v1522_v48 = vrot.slane %v1521_v46, 4  ;;  %v1511_v49 = vpop.f32.mrf.mxu0 }
 0xfc1   :  { %v1515_v50 = vadd.f32 %v1511_v49, %v1378_v45  ;;  %v1584_v45 = vperm.slane %v2545_v38, 2 }
 0xfc2   :  { %v1523_v51 = vadd.f32 %v1522_v48, %v1521_v46 }
 0xfc3   :  { %v1518_v52 = vadd.f32 %v1516_v6, %v1515_v50 }
 0xfc4   :  { %v1524_v53 = vrot.slane %v1523_v51, 2 }
 0xfc5   :  { %v1520_v54 = vadd.f32 %v1518_v52, %v2415_v39  ;;  %v1922_v52 = vld [vmem:[%s2605_s5 + $0x38] sm:$0xff] }
 0xfc6   :  { %v1525_v55 = vadd.f32 %v1524_v53, %v1523_v51  ;;  %1671 = vmatpush.bf16.msrb.mxu2 %v1922_v52  ;;  %v1921_v53 = vld [vmem:[%s2605_s5 + $0x30] sm:$0xff] }
 0xfc7   :  { %v1528_v56 = vsel %vm127_vm1, %v1520_v54, 0.0 }
 0xfc8   :  { %v1526_v57 = vrot.slane %v1525_v55, 1  ;;  %v1529_v59 = vrot.slane %v1528_v56, 4 }
 0xfca   :  { %v1527_v60 = vadd.f32 %v1526_v57, %v1525_v55  ;;  %v1530_v15 = vadd.f32 %v1529_v59, %v1528_v56  ;;  %1672 = vmatpush.bf16.msrb.mxu2 %v1921_v53  ;;  %v1919_v55 = vld [vmem:[%s2605_s5 + $0x20] sm:$0xff]  ;;  %v1944_v57 = vld [vmem:[#allocation7 + $0x1] ss:$0 sm:$0xff] }
 0xfcc   :  { %v1535_v11 = vmul.f32 %v1527_v60, %v2366_v29  ;;  %v1531_v58 = vrot.slane %v1530_v15, 2 }
 0xfce   :  { %v1537_v61 = vsub.f32 %v1519_v1, %v1535_v11  ;;  %v1532_v62 = vadd.f32 %v1531_v58, %v1530_v15 }
 0xfd0   :  { %v1539_v63 = vmul.f32 %v1537_v61, %v1537_v61  ;;  %v1533_v0 = vrot.slane %v1532_v62, 1 }
 0xfd2   :  { %v1541_v2 = vsel %vm127_vm1, %v1539_v63, 0.0  ;;  %v1534_v3 = vadd.f32 %v1533_v0, %v1532_v62  ;;  %v1639_v62 = vperm.slane %v2545_v38, 3 }
 0xfd3   :  { %v1542_v4 = vrot.slane %v1541_v2, 4 }
 0xfd4   :  { %v1536_v39 = vmul.f32 %v1534_v3, %v2366_v29 }
 0xfd5   :  { %v1543_v7 = vadd.f32 %v1542_v4, %v1541_v2 }
 0xfd6   :  { %v1538_v8 = vsub.f32 %v1520_v54, %v1536_v39  ;;  %v1920_v54 = vld [vmem:[%s2605_s5 + $0x28] sm:$0xff]  ;;  %s2148_s5 = smov [#allocation8]  }
 0xfd7   :  { %v1544_v9 = vrot.slane %v1543_v7, 2  ;;  %1673 = vmatpush.bf16.msrb.mxu2 %v1920_v54  ;;  %s1755_s22 = sshll.u32 %s2148_s5, 4  ;;  %s1756_s22 = int_to_ptr.vmem [resolvable:$true] %s1755_s22 }
 0xfd8   :  { %v1540_v10 = vmul.f32 %v1538_v8, %v1538_v8 }
 0xfd9   :  { %v1545_v44 = vadd.f32 %v1544_v9, %v1543_v7 }
 0xfda   :  { %v1548_v12 = vsel %vm127_vm1, %v1540_v10, 0.0 }
 0xfdb   :  { %v1546_v13 = vrot.slane %v1545_v44, 1  ;;  %v1549_v14 = vrot.slane %v1548_v12, 4  ;;  %1674 = vmatpush.bf16.msrb.mxu2 %v1919_v55  ;;  %v1743_v55 = vperm.slane %v2545_v38, 4 }
 0xfdd   :  { %v1547_v16 = vadd.f32 %v1546_v13, %v1545_v44  ;;  %v1550_v18 = vadd.f32 %v1549_v14, %v1548_v12 }
 0xfdf   :  { %v1555_v20 = vmul.f32 %v1547_v16, %v2366_v29  ;;  %v1551_v21 = vrot.slane %v1550_v18, 2 }
 0xfe1   :  { %v1557_v17 = vadd.f32 1e-05, %v1555_v20  ;;  %v1552_v23 = vadd.f32 %v1551_v21, %v1550_v18 }
 0xfe3   :  { %2019 = vrsqrt.f32 %v1557_v17  ;;  %v1553_v25 = vrot.slane %v1552_v23, 1  ;;  %vm1565_vm2 = vweird.f32 %v1557_v17 }
 0xfe5   :  { %v1554_v26 = vadd.f32 %v1553_v25, %v1552_v23 }
 0xfe7   :  { %v1556_v27 = vmul.f32 %v1554_v26, %v2366_v29 }
 0xfe9   :  { %v2020_v22 = vpop.eup %2019  ;;  %v1558_v28 = vadd.f32 1e-05, %v1556_v27 }
 0xfea   :  { %v1560_v5 = vmul.f32 %v2020_v22, %v1557_v17  ;;  %vm1566_vm0 = vweird.f32 %v2020_v22 }
 0xfeb   :  { %2021 = vrsqrt.f32 %v1558_v28  ;;  %vm1567_vm4 = vmor %vm1565_vm2, %vm1566_vm0  ;;  %vm1575_vm6 = vweird.f32 %v1558_v28 }
 0xfec   :  { %v1561_v47 = vmul.f32 %v2020_v22, %v1560_v5 }
 0xfee   :  { %v1562_v30 = vmul.f32 0.5, %v1561_v47 }
 0xff0   :  { %v1563_v31 = vsub.f32 1.5, %v1562_v30 }
 0xff1   :  { %v2022_v32 = vpop.eup %2021 }
 0xff2   :  { %v1564_v33 = vmul.f32 %v2020_v22, %v1563_v31  ;;  %v1570_v34 = vmul.f32 %v2022_v32, %v1558_v28  ;;  %vm1576_vm5 = vweird.f32 %v2022_v32 }
 0xff3   :  { %vm1577_vm7 = vmor %vm1575_vm6, %vm1576_vm5 }
 0xff4   :  { %v1571_v35 = vmul.f32 %v2022_v32, %v1570_v34  ;;  %v1568_v36 = vsel %vm1567_vm4, %v2020_v22, %v1564_v33 }
 0xff5   :  { %v1579_v40 = vmul.f32 %v1568_v36, %v1537_v61 }
 0xff6   :  { %v1572_v37 = vmul.f32 0.5, %v1571_v35 }
 0xff7   :  { %v1582_v1 = vmul.f32 %v1581_v41, %v1579_v40 }
 0xff8   :  { %v1573_v6 = vsub.f32 1.5, %v1572_v37 }
 0xff9   :  { %v1585_v49 = vadd.f32 %v1584_v45, %v1582_v1 }
 0xffa   :  { %v1574_v42 = vmul.f32 %v2022_v32, %v1573_v6 }
 0xffc   :  { %v1578_v43 = vsel %vm1577_vm7, %v2022_v32, %v1574_v42 }
 0xffd   :  { %v1580_v46 = vmul.f32 %v1578_v43, %v1538_v8 }
 0xfff   :  { %v1583_v48 = vmul.f32 %v1581_v41, %v1580_v46 }
0x1001   :  { %v1586_v50 = vadd.f32 %v1584_v45, %v1583_v48 }
0x1003   :  { %v1587_v51 = vpack.c.bf16 %v1586_v50, %v1585_v49 }
0x1005   :  { %1881 = vmatmul.msk.bf16.vlgmr.msrb.gmra.mxu1 %vm127_vm1, %v1587_v51 }
0x1082   :  { %v1622_v56 = vpop.f32.mrf.mxu1 }
0x1083   :  { %v1623_v59 = vadd.f32 %v1944_v57, %v1622_v56 }
0x1085   :  { %v1627_v11 = vmax.f32 %v1623_v59, 0.0 }
0x108a   :  { %v1624_v60 = vpop.f32.mrf.mxu1 }
0x108b   :  { %v1625_v15 = vadd.f32 %v1944_v57, %v1624_v60 }
0x108d   :  { %v1628_v58 = vmax.f32 %v1625_v15, 0.0 }
0x108f   :  { %v1629_v61 = vpack.c.bf16 %v1628_v58, %v1627_v11 }
0x1091   :  { %1906 = vmatmul.msk.bf16.vlgmr.msrb.gmra.mxu2 %vm845_vm10, %v1629_v61 }
0x1114   :  { %v1676_v63 = vpop.f32.mrf.mxu2 }
0x1115   :  { %v1677_v0 = vadd.f32 %v1676_v63, %v1639_v62 }
0x1117   :  { %v1681_v2 = vadd.f32 %v1677_v0, %v1585_v49 }
0x1119   :  { %v1683_v3 = vsel %vm127_vm1, %v1681_v2, 0.0 }
0x111a   :  { %v1684_v4 = vrot.slane %v1683_v3, 4 }
0x111c   :  { %v1685_v39 = vadd.f32 %v1684_v4, %v1683_v3  ;;  %v1678_v7 = vpop.f32.mrf.mxu2 }
0x111d   :  { %v1679_v8 = vadd.f32 %v1678_v7, %v1639_v62 }
0x111e   :  { %v1686_v9 = vrot.slane %v1685_v39, 2 }
0x111f   :  { %v1682_v10 = vadd.f32 %v1679_v8, %v1586_v50 }
0x1120   :  { %v1687_v44 = vadd.f32 %v1686_v9, %v1685_v39 }
0x1121   :  { %v1690_v12 = vsel %vm127_vm1, %v1682_v10, 0.0 }
0x1122   :  { %v1688_v13 = vrot.slane %v1687_v44, 1  ;;  %v1691_v14 = vrot.slane %v1690_v12, 4 }
0x1124   :  { %v1689_v16 = vadd.f32 %v1688_v13, %v1687_v44  ;;  %v1692_v18 = vadd.f32 %v1691_v14, %v1690_v12 }
0x1126   :  { %v1697_v19 = vmul.f32 %v1689_v16, %v2366_v29  ;;  %v1693_v20 = vrot.slane %v1692_v18, 2 }
0x1128   :  { %v1699_v21 = vsub.f32 %v1681_v2, %v1697_v19  ;;  %v1694_v17 = vadd.f32 %v1693_v20, %v1692_v18 }
0x112a   :  { %v1701_v23 = vmul.f32 %v1699_v21, %v1699_v21  ;;  %v1695_v24 = vrot.slane %v1694_v17, 1 }
0x112c   :  { %v1703_v25 = vsel %vm127_vm1, %v1701_v23, 0.0  ;;  %v1696_v26 = vadd.f32 %v1695_v24, %v1694_v17 }
0x112d   :  { %v1704_v27 = vrot.slane %v1703_v25, 4 }
0x112e   :  { %v1698_v22 = vmul.f32 %v1696_v26, %v2366_v29 }
0x112f   :  { %v1705_v28 = vadd.f32 %v1704_v27, %v1703_v25 }
0x1130   :  { %v1700_v5 = vsub.f32 %v1682_v10, %v1698_v22 }
0x1131   :  { %v1706_v47 = vrot.slane %v1705_v28, 2 }
0x1132   :  { %v1702_v30 = vmul.f32 %v1700_v5, %v1700_v5 }
0x1133   :  { %v1707_v31 = vadd.f32 %v1706_v47, %v1705_v28 }
0x1134   :  { %v1710_v32 = vsel %vm127_vm1, %v1702_v30, 0.0 }
0x1135   :  { %v1708_v33 = vrot.slane %v1707_v31, 1  ;;  %v1711_v34 = vrot.slane %v1710_v32, 4 }
0x1137   :  { %v1709_v35 = vadd.f32 %v1708_v33, %v1707_v31  ;;  %v1712_v36 = vadd.f32 %v1711_v34, %v1710_v32 }
0x1139   :  { %v1717_v37 = vmul.f32 %v1709_v35, %v2366_v29  ;;  %v1713_v6 = vrot.slane %v1712_v36, 2 }
0x113b   :  { %v1719_v40 = vadd.f32 1e-05, %v1717_v37  ;;  %v1714_v41 = vadd.f32 %v1713_v6, %v1712_v36 }
0x113d   :  { %2023 = vrsqrt.f32 %v1719_v40  ;;  %v1715_v42 = vrot.slane %v1714_v41, 1  ;;  %vm1727_vm9 = vweird.f32 %v1719_v40 }
0x113f   :  { %v1716_v43 = vadd.f32 %v1715_v42, %v1714_v41 }
0x1141   :  { %v1718_v1 = vmul.f32 %v1716_v43, %v2366_v29  ;;  %v1746_v29 = vperm.slane %v2545_v38, 5 }
0x1143   :  { %v2024_v45 = vpop.eup %2023  ;;  %v1720_v46 = vadd.f32 1e-05, %v1718_v1 }
0x1144   :  { %v1722_v48 = vmul.f32 %v2024_v45, %v1719_v40  ;;  %vm1728_vm8 = vweird.f32 %v2024_v45 }
0x1145   :  { %2025 = vrsqrt.f32 %v1720_v46  ;;  %vm1729_vm10 = vmor %vm1727_vm9, %vm1728_vm8  ;;  %vm1737_vm12 = vweird.f32 %v1720_v46 }
0x1146   :  { %v1723_v49 = vmul.f32 %v2024_v45, %v1722_v48 }
0x1148   :  { %v1724_v50 = vmul.f32 0.5, %v1723_v49 }
0x114a   :  { %v1725_v51 = vsub.f32 1.5, %v1724_v50 }
0x114b   :  { %v2026_v52 = vpop.eup %2025 }
0x114c   :  { %v1726_v53 = vmul.f32 %v2024_v45, %v1725_v51  ;;  %v1732_v54 = vmul.f32 %v2026_v52, %v1720_v46  ;;  %vm1738_vm11 = vweird.f32 %v2026_v52 }
0x114d   :  { %vm1739_vm13 = vmor %vm1737_vm12, %vm1738_vm11 }
0x114e   :  { %v1730_v56 = vsel %vm1729_vm10, %v2024_v45, %v1726_v53  ;;  %v1733_v57 = vmul.f32 %v2026_v52, %v1732_v54 }
0x114f   :  { %v1741_v59 = vmul.f32 %v1730_v56, %v1699_v21 }
0x1150   :  { %v1734_v60 = vmul.f32 0.5, %v1733_v57 }
0x1151   :  { %v1744_v15 = vmul.f32 %v1743_v55, %v1741_v59 }
0x1152   :  { %v1735_v11 = vsub.f32 1.5, %v1734_v60 }
0x1153   :  { %v1747_v58 = vadd.f32 %v1746_v29, %v1744_v15 }
0x1154   :  { %v1736_v61 = vmul.f32 %v2026_v52, %v1735_v11 }
0x1155   :  { %1749 = vst.msk [vmem:[#allocation8] sm:$0xff] %vm127_vm1, %v1747_v58 }
0x1156   :  { %v1740_v62 = vsel %vm1739_vm13, %v2026_v52, %v1736_v61 }
0x1157   :  { %v1742_v63 = vmul.f32 %v1740_v62, %v1700_v5 }
0x1159   :  { %v1745_v0 = vmul.f32 %v1743_v55, %v1742_v63 }
0x115b   :  { %v1748_v38 = vadd.f32 %v1746_v29, %v1745_v0 }
0x115d   :  { %1750 = vst.msk [vmem:[#allocation8 + $0x8] sm:$0xff] %vm127_vm1, %v1748_v38 }
0x115e   :  { %1763 = dma.vmem_to_hbm [thread:$0]  %s1756_s22, 256, %s1758_s13, [#allocation4], %s2131_s15, %s2131_s15, %s2132_s16  }
0x115f   :  { %2127 = dma.done.wait [#allocation4], 256  }
0x1160   :  { %2128 = vsyncadd [#allocation4], 4294967040 }
0x1161   :  { %1768 = vsyncpa [#allocation3], 1 }
0x1162   :  { %1769 = vsyncpa [#allocation6], 1 }
0x1163   :  { %1770 = vsyncpa [#allocation4], 1 }

</bundles_post_ra>
